<compile_context>
chip_gen: v7x
topology: tpu7x:2x2x1
jax: 0.10.0
libtpu: 0.0.40
codegen_flags: <defaults>
</compile_context>

<pallas_src>
import functools
import math

import jax
import jax.numpy as jnp
import numpy as np
from jax.experimental import pallas as pl
from jax.experimental.pallas import tpu as pltpu


# ----------------------------------------------------------------------------
# VMEM budget / tile-size helpers
# ----------------------------------------------------------------------------
@functools.lru_cache(maxsize=None)
def _vmem_limit_bytes():
    """Scoped-VMEM cap: above the conservative per-generation defaults
    (16 MiB v5e / 32 MiB v6e,v7x) but safely under physical capacity."""
    try:
        cap = pltpu.get_tpu_info().vmem_capacity_bytes
    except Exception:
        cap = 64 * 1024 * 1024
    return int(min(max(cap - 16 * 1024 * 1024, 32 * 1024 * 1024),
                   100 * 1024 * 1024))


def _mosaic_params(dimension_semantics):
    return pltpu.CompilerParams(dimension_semantics=dimension_semantics,
                                vmem_limit_bytes=_vmem_limit_bytes())


def _tile_rows(M, cap=512):
    """Row (sublane-major) tile: full dim if small, else a 128-multiple."""
    if M <= cap:
        return M
    for t in (512, 384, 256, 128):
        if M % t == 0:
            return t
    return cap


def _tile_lane(D, cap=1024):
    """Lane-dim tile: full dim unless it splits evenly into 128-multiples
    (keeps the reduction axis free of out-of-range garbage)."""
    if D <= cap or D % 128 != 0:
        return D
    for t in (1024, 768, 512, 384, 256, 128):
        if t <= cap and D % t == 0:
            return t
    return D


def _apply_activation(x, activation):
    if activation == "relu":
        return jnp.maximum(x, 0.0)
    if activation == "gelu":
        # exact erf gelu, matching torch.nn.functional.gelu's default
        return jax.nn.gelu(x, approximate=False)
    return x


# ----------------------------------------------------------------------------
# Generic tiled matmul kernel:  y = act(x @ w (+ b))
# The f32 output block is resident across the K grid axis and doubles as the
# accumulator (no VMEM scratch); operands are cast to bf16 per-tile in-kernel.
# ----------------------------------------------------------------------------
def _make_linear_kernel(has_bias, activation):
    def _accumulate(x_ref, w_ref, o_ref):
        @pl.when(pl.program_id(2) == 0)
        def _():
            o_ref[...] = jnp.zeros_like(o_ref)

        o_ref[...] += jnp.dot(x_ref[...].astype(jnp.bfloat16), w_ref[...],
                              preferred_element_type=jnp.float32)

    def _finalize(o_ref, b_ref):
        acc = o_ref[...]
        if has_bias:
            acc = acc + b_ref[...]
        o_ref[...] = _apply_activation(acc, activation)

    if has_bias:
        def kernel(x_ref, w_ref, b_ref, o_ref):
            _accumulate(x_ref, w_ref, o_ref)

            @pl.when(pl.program_id(2) == pl.num_programs(2) - 1)
            def _():
                _finalize(o_ref, b_ref)
    else:
        def kernel(x_ref, w_ref, o_ref):
            _accumulate(x_ref, w_ref, o_ref)

            @pl.when(pl.program_id(2) == pl.num_programs(2) - 1)
            def _():
                _finalize(o_ref, None)
    return kernel


def pallas_linear(x, w, b=None, activation=None):
    """y = act(x @ w + b); x: (..., K), w: (K, N), b: (N,) or None."""
    orig_shape = x.shape
    K = orig_shape[-1]
    N = w.shape[-1]

    # Tiny contraction dims (Date2Vec marks, K=2): MXU / kernel launch not
    # worth it -- plain JAX keeps semantics identical.
    if K < 8:
        y = jnp.dot(x.astype(jnp.float32), w.astype(jnp.float32))
        if b is not None:
            y = y + b.astype(jnp.float32)
        return _apply_activation(y, activation)

    x2 = x.reshape(-1, K).astype(jnp.float32)     # no wrapper-side bf16 cast
    w2 = w.astype(jnp.bfloat16)                   # params: constant-folded
    M = x2.shape[0]

    tm = _tile_rows(M)
    tn = _tile_lane(N)
    tk = _tile_lane(K)                            # divides K (or equals it)
    grid = (pl.cdiv(M, tm), pl.cdiv(N, tn), pl.cdiv(K, tk))

    in_specs = [
        pl.BlockSpec((tm, tk), lambda i, j, k: (i, k)),
        pl.BlockSpec((tk, tn), lambda i, j, k: (k, j)),
    ]
    args = [x2, w2]
    if b is not None:
        in_specs.append(pl.BlockSpec((1, tn), lambda i, j, k: (0, j)))
        args.append(b.reshape(1, N).astype(jnp.float32))

    out = pl.pallas_call(
        _make_linear_kernel(b is not None, activation),
        grid=grid,
        in_specs=in_specs,
        out_specs=pl.BlockSpec((tm, tn), lambda i, j, k: (i, j)),
        out_shape=jax.ShapeDtypeStruct((M, N), jnp.float32),
        compiler_params=_mosaic_params(("parallel", "parallel", "arbitrary")),
    )(*args)
    return out.reshape(orig_shape[:-1] + (N,))


# ----------------------------------------------------------------------------
# Series decomposition: moving average as one MXU matmul (padding folded in)
# ----------------------------------------------------------------------------
def moving_avg_matrix(L, k):
    """(L, L) matrix A with A @ x == Autoformer edge-replicated moving average.
    Assumes an odd kernel size (pad = (k-1)//2 on both sides)."""
    pad = (k - 1) // 2
    t = np.arange(L)[:, None]
    i = np.arange(L)[None, :]
    w = ((i >= t - pad) & (i <= t + pad)).astype(np.float32)
    w[:, 0] += np.maximum(pad - np.arange(L), 0)
    w[:, -1] += np.maximum(np.arange(L) + pad - (L - 1), 0)
    return jnp.asarray(w / float(k), dtype=jnp.float32)


def _decomp_kernel(a_ref, x_ref, res_ref, mean_ref):
    x = x_ref[0]                                           # (L, td) f32
    mean = jnp.dot(a_ref[...], x.astype(jnp.bfloat16),
                   preferred_element_type=jnp.float32)
    mean_ref[0] = mean
    res_ref[0] = x - mean


def _decomp_add_kernel(a_ref, x_ref, y_ref, res_ref, mean_ref):
    s = x_ref[0] + y_ref[0]                                # fused residual add
    mean = jnp.dot(a_ref[...], s.astype(jnp.bfloat16),
                   preferred_element_type=jnp.float32)
    mean_ref[0] = mean
    res_ref[0] = s - mean


def series_decomp(x, A, add=None):
    """x (and optional residual `add`): (B, L, D). Returns (res, mean)."""
    B, L, D = x.shape
    x = x.astype(jnp.float32)
    td = _tile_lane(D, cap=256)          # second parallel axis (v7x: 2 TCs)
    grid = (B, pl.cdiv(D, td))
    a_spec = pl.BlockSpec((L, L), lambda b, d: (0, 0))
    x_spec = pl.BlockSpec((1, L, td), lambda b, d: (b, 0, d))
    common = dict(
        grid=grid,
        out_specs=(
            pl.BlockSpec((1, L, td), lambda b, d: (b, 0, d)),
            pl.BlockSpec((1, L, td), lambda b, d: (b, 0, d)),
        ),
        out_shape=(
            jax.ShapeDtypeStruct((B, L, D), jnp.float32),
            jax.ShapeDtypeStruct((B, L, D), jnp.float32),
        ),
        compiler_params=_mosaic_params(("parallel", "parallel")),
    )
    A_bf = A.astype(jnp.bfloat16)
    if add is None:
        res, mean = pl.pallas_call(
            _decomp_kernel, in_specs=[a_spec, x_spec], **common)(A_bf, x)
    else:
        res, mean = pl.pallas_call(
            _decomp_add_kernel, in_specs=[a_spec, x_spec, x_spec], **common)(
                A_bf, x, add.astype(jnp.float32))
    return res, mean


# ----------------------------------------------------------------------------
# Fused FFN + decomposition (one per-batch kernel, intermediates in VMEM):
#   y = x + conv2(act(conv1(x)));  mean = A @ y;  res = y - mean
# ----------------------------------------------------------------------------
def _make_ffn_decomp_kernel(activation):
    def kernel(a_ref, x_ref, w1_ref, w2_ref, res_ref, mean_ref):
        x = x_ref[0]                                       # (L, D) f32
        h = jnp.dot(x.astype(jnp.bfloat16), w1_ref[...],
                    preferred_element_type=jnp.float32)
        h = _apply_activation(h, activation)
        y = x + jnp.dot(h.astype(jnp.bfloat16), w2_ref[...],
                        preferred_element_type=jnp.float32)
        mean = jnp.dot(a_ref[...], y.astype(jnp.bfloat16),
                       preferred_element_type=jnp.float32)
        mean_ref[0] = mean
        res_ref[0] = y - mean
    return kernel


def ffn_decomp(x, w1, w2, A, activation):
    """Fused (x + FFN(x)) followed by series_decomp.  Returns (res, mean)."""
    B, L, D = x.shape
    dff = w1.shape[-1]
    res, mean = pl.pallas_call(
        _make_ffn_decomp_kernel(activation),
        grid=(B,),
        in_specs=[
            pl.BlockSpec((L, L), lambda b: (0, 0)),
            pl.BlockSpec((1, L, D), lambda b: (b, 0, 0)),
            pl.BlockSpec((D, dff), lambda b: (0, 0)),
            pl.BlockSpec((dff, D), lambda b: (0, 0)),
        ],
        out_specs=(
            pl.BlockSpec((1, L, D), lambda b: (b, 0, 0)),
            pl.BlockSpec((1, L, D), lambda b: (b, 0, 0)),
        ),
        out_shape=(
            jax.ShapeDtypeStruct((B, L, D), jnp.float32),
            jax.ShapeDtypeStruct((B, L, D), jnp.float32),
        ),
        compiler_params=_mosaic_params(("parallel",)),
    )(A.astype(jnp.bfloat16), x.astype(jnp.float32),
      w1.astype(jnp.bfloat16), w2.astype(jnp.bfloat16))
    return res, mean


# ----------------------------------------------------------------------------
# my_Layernorm: LayerNorm over D, then subtract mean over the sequence dim
# ----------------------------------------------------------------------------
def _mylayernorm_kernel(x_ref, g_ref, b_ref, o_ref, *, eps):
    x = x_ref[0]                                           # (L, D)
    mu = jnp.mean(x, axis=-1, keepdims=True)
    xc = x - mu
    var = jnp.mean(xc * xc, axis=-1, keepdims=True)
    xh = xc * jax.lax.rsqrt(var + eps) * g_ref[...] + b_ref[...]
    o_ref[0] = xh - jnp.mean(xh, axis=0, keepdims=True)


def my_layernorm(x, gamma, beta, eps=1e-5):
    B, L, D = x.shape
    return pl.pallas_call(
        functools.partial(_mylayernorm_kernel, eps=eps),
        grid=(B,),
        in_specs=[
            pl.BlockSpec((1, L, D), lambda b: (b, 0, 0)),
            pl.BlockSpec((1, D), lambda b: (0, 0)),
            pl.BlockSpec((1, D), lambda b: (0, 0)),
        ],
        out_specs=pl.BlockSpec((1, L, D), lambda b: (b, 0, 0)),
        out_shape=jax.ShapeDtypeStruct((B, L, D), jnp.float32),
        compiler_params=_mosaic_params(("parallel",)),
    )(x.astype(jnp.float32), gamma.reshape(1, D).astype(jnp.float32),
      beta.reshape(1, D).astype(jnp.float32))


# ----------------------------------------------------------------------------
# Circular k=3 conv1d: taps folded into one matmul in-kernel
# (jnp.roll supports negative shifts and is safe in every lowering mode;
#  pltpu.roll rejects negative shifts.)
# ----------------------------------------------------------------------------
def _make_conv3_kernel(has_add):
    def _body(x_ref, w_ref, add_ref, o_ref):
        x = x_ref[0]                                       # (L, Cin) f32
        # out[t] = w0 @ x[t-1] + w1 @ x[t] + w2 @ x[t+1]   (circular padding)
        stacked = jnp.concatenate(
            [jnp.roll(x, 1, axis=0), x, jnp.roll(x, -1, axis=0)], axis=-1)
        acc = jnp.dot(stacked.astype(jnp.bfloat16), w_ref[...],
                      preferred_element_type=jnp.float32)
        if add_ref is not None:
            acc = acc + add_ref[...]
        o_ref[0] = acc

    if has_add:
        def kernel(x_ref, w_ref, add_ref, o_ref):
            _body(x_ref, w_ref, add_ref, o_ref)
    else:
        def kernel(x_ref, w_ref, o_ref):
            _body(x_ref, w_ref, None, o_ref)
    return kernel


def circular_conv1d_k3(x, w_taps, add=None):
    """Conv1d(kernel=3, padding=1, padding_mode='circular', bias=False).
    x: (B, L, Cin), w_taps: (3, Cin, Cout), optional add: (L, Cout) fused in."""
    B, L, Cin = x.shape
    Cout = w_taps.shape[-1]
    w = w_taps.reshape(3 * Cin, Cout).astype(jnp.bfloat16)   # taps along K
    in_specs = [
        pl.BlockSpec((1, L, Cin), lambda b: (b, 0, 0)),
        pl.BlockSpec((3 * Cin, Cout), lambda b: (0, 0)),
    ]
    args = [x.astype(jnp.float32), w]
    if add is not None:
        in_specs.append(pl.BlockSpec((L, Cout), lambda b: (0, 0)))
        args.append(add.astype(jnp.float32))
    return pl.pallas_call(
        _make_conv3_kernel(add is not None),
        grid=(B,),
        in_specs=in_specs,
        out_specs=pl.BlockSpec((1, L, Cout), lambda b: (b, 0, 0)),
        out_shape=jax.ShapeDtypeStruct((B, L, Cout), jnp.float32),
        compiler_params=_mosaic_params(("parallel",)),
    )(*args)


# ----------------------------------------------------------------------------
# Frequency-domain mixing via precomputed low-mode real-DFT bases
# (replaces full-length rfft/irfft + zero-padded scatter; the complex
#  per-head mixing stays in plain JAX -- no complex dtype in Pallas TPU)
# ----------------------------------------------------------------------------
@functools.lru_cache(maxsize=None)
def _dft_bases(L, M):
    l = np.arange(L, dtype=np.float64)[:, None]
    m = np.arange(M, dtype=np.float64)[None, :]
    ang = 2.0 * np.pi * l * m / L
    fwd_cos = np.cos(ang).astype(np.float32)               # (L, M)
    fwd_sin = np.sin(ang).astype(np.float32)
    scale = np.full((M, 1), 2.0 / L)
    scale[0, 0] = 1.0 / L
    inv_cos = (scale * np.cos(ang.T)).astype(np.float32)    # (M, L)
    inv_sin = (-scale * np.sin(ang.T)).astype(np.float32)
    inv_sin[0, :] = 0.0                # irfft drops the DC imaginary part
    return (jnp.asarray(fwd_cos), jnp.asarray(fwd_sin),
            jnp.asarray(inv_cos), jnp.asarray(inv_sin))


def fourier_block(q, weights):
    """FEDformer FourierBlock. q: (B, L, H, E), weights: (H, E, E, M) complex."""
    B, L, H, E = q.shape
    M = weights.shape[-1]
    fc, fs, ic, isn = _dft_bases(L, M)
    x = jnp.transpose(q, (0, 2, 3, 1))                      # (B, H, E, L)
    x_ft = (jnp.einsum("bhel,lm->bhem", x, fc)
            - 1j * jnp.einsum("bhel,lm->bhem", x, fs)).astype(jnp.complex64)
    out = jnp.einsum("bhem,heom->bhom", x_ft, weights)      # M low modes only
    return (jnp.einsum("bhom,ml->bhol", jnp.real(out), ic)
            + jnp.einsum("bhom,ml->bhol", jnp.imag(out), isn))   # (B, H, E, L)


def fourier_cross_attention(q, k, v, weights, d_model):
    """FEDformer FourierCrossAttention (activation='tanh', low-mode select)."""
    B, L, H, E = q.shape
    S = k.shape[1]
    M = weights.shape[-1]
    fcq, fsq, ic, isn = _dft_bases(L, M)
    fck, fsk, _, _ = _dft_bases(S, M)
    xq = jnp.transpose(q, (0, 2, 3, 1))
    xk = jnp.transpose(k, (0, 2, 3, 1))
    xq_ft = (jnp.einsum("bhel,lm->bhem", xq, fcq)
             - 1j * jnp.einsum("bhel,lm->bhem", xq, fsq)).astype(jnp.complex64)
    xk_ft = (jnp.einsum("bhel,lm->bhem", xk, fck)
             - 1j * jnp.einsum("bhel,lm->bhem", xk, fsk)).astype(jnp.complex64)
    xqk_ft = jnp.tanh(jnp.einsum("bhex,bhey->bhxy", xq_ft, xk_ft))
    xqkv_ft = jnp.einsum("bhxy,bhey->bhex", xqk_ft, xk_ft)
    xqkvw = jnp.einsum("bhex,heox->bhox", xqkv_ft, weights) / d_model / d_model
    return (jnp.einsum("bhom,ml->bhol", jnp.real(xqkvw), ic)
            + jnp.einsum("bhom,ml->bhol", jnp.imag(xqkvw), isn))


# ----------------------------------------------------------------------------
# Glue components
# ----------------------------------------------------------------------------
def positional_embedding(L, d_model):
    pos = np.arange(L, dtype=np.float32)[:, None]
    div = np.exp(np.arange(0, d_model, 2, dtype=np.float32)
                 * (-math.log(10000.0) / d_model))
    pe = np.zeros((L, d_model), np.float32)
    pe[:, 0::2] = np.sin(pos * div)
    pe[:, 1::2] = np.cos(pos * div)
    return jnp.asarray(pe)


def data_embedding(x, p, d_model):
    # TODO(synk): DataEmbedding_value source not provided; conv1d(k=3, circular)
    # token embedding + sinusoidal positional embedding (dropout = eval identity).
    pe = positional_embedding(x.shape[1], d_model)
    return circular_conv1d_k3(x, p["tok_w"], add=pe)


def d2v_fourier(x_feat, mark, p, mode):
    # TODO(synk): Date2Vec_Fourier source not provided; Time2Vec-style surrogate
    # (per-feature linear + sin embedding of calendar marks).  K=2 contraction
    # -> pallas_linear falls back to plain JAX (MXU/launch not worth it).
    B, dm, Lt = mark.shape
    F_, _, K = p["W"].shape
    mark_t = jnp.transpose(mark, (0, 2, 1))                        # (B, Lt, dm)
    W2 = jnp.transpose(p["W"], (1, 0, 2)).reshape(dm, F_ * K)
    b2 = p["b"].reshape(F_ * K)
    lin = pallas_linear(mark_t, W2, b2).reshape(B, Lt, F_, K)
    out = jnp.concatenate([lin[..., :1], jnp.sin(lin[..., 1:])], axis=-1)
    return jnp.transpose(out, (0, 2, 1, 3))                        # (B, F, Lt, K)


# ----------------------------------------------------------------------------
# Attention blocks (fused QKV / KV projections)
# ----------------------------------------------------------------------------
def self_attention_block(x, p, n_heads, inner_fn):
    B, L, dm = x.shape
    qkv = pallas_linear(x, p["Wqkv"], p["bqkv"])                   # one wide matmul
    q = qkv[..., :dm].reshape(B, L, n_heads, -1)
    k = qkv[..., dm:2 * dm].reshape(B, L, n_heads, -1)
    v = qkv[..., 2 * dm:].reshape(B, L, n_heads, -1)
    out = inner_fn(q, k, v).reshape(B, L, -1)   # FEDformer view-without-permute quirk
    return pallas_linear(out, p["Wo"], p["bo"])


def cross_attention_block(x, cross, p, n_heads, inner_fn):
    B, L, dm = x.shape
    S = cross.shape[1]
    q = pallas_linear(x, p["Wq"], p["bq"]).reshape(B, L, n_heads, -1)
    kv = pallas_linear(cross, p["Wkv"], p["bkv"])                  # fused K/V matmul
    k = kv[..., :dm].reshape(B, S, n_heads, -1)
    v = kv[..., dm:].reshape(B, S, n_heads, -1)
    out = inner_fn(q, k, v).reshape(B, L, -1)
    return pallas_linear(out, p["Wo"], p["bo"])


# ----------------------------------------------------------------------------
# Encoder / decoder
# ----------------------------------------------------------------------------
def encoder_layer(x, p, cfg, A):
    attn_out = self_attention_block(
        x, p["attn"], cfg["n_heads"],
        lambda q, k, v: fourier_block(q, p["attn"]["fw"]))
    x, _ = series_decomp(x, A, add=attn_out)                 # residual add fused
    res, _ = ffn_decomp(x, p["conv1_w"], p["conv2_w"], A, cfg["activation"])
    return res


def encoder_forward(x, p, cfg, A):
    for lp in p["layers"]:
        x = encoder_layer(x, lp, cfg, A)
    return my_layernorm(x, p["norm_g"], p["norm_b"])


def decoder_layer(x, cross, p, cfg, A):
    H, dm = cfg["n_heads"], cfg["d_model"]
    self_out = self_attention_block(
        x, p["self_attn"], H,
        lambda q, k, v: fourier_block(q, p["self_attn"]["fw"]))
    x, trend1 = series_decomp(x, A, add=self_out)
    cross_out = cross_attention_block(
        x, cross, p["cross_attn"], H,
        lambda q, k, v: fourier_cross_attention(q, k, v, p["cross_attn"]["fw"], dm))
    x, trend2 = series_decomp(x, A, add=cross_out)
    x, trend3 = ffn_decomp(x, p["conv1_w"], p["conv2_w"], A, cfg["activation"])
    residual_trend = circular_conv1d_k3(trend1 + trend2 + trend3, p["proj_w"])
    return x, residual_trend


def decoder_forward(x, cross, trend, p, cfg, A):
    for lp in p["layers"]:
        x, residual_trend = decoder_layer(x, cross, lp, cfg, A)
        trend = trend + residual_trend
    x = my_layernorm(x, p["norm_g"], p["norm_b"])
    x = pallas_linear(x, p["proj_w"], p["proj_b"])
    return x, trend


# ----------------------------------------------------------------------------
# Full model forward (mirrors D2V_Fedformer.forward)
# ----------------------------------------------------------------------------
def d2v_fedformer_forward(params, cfg, x_enc, x_mark_enc, x_dec, x_mark_dec, *, mode):
    pred_len, label_len = cfg["pred_len"], cfg["label_len"]
    L_enc = x_enc.shape[1]
    L_dec = label_len + pred_len
    A_enc = moving_avg_matrix(L_enc, cfg["moving_avg"])
    A_dec = moving_avg_matrix(L_dec, cfg["moving_avg"])

    mean = jnp.repeat(jnp.mean(x_enc, axis=1, keepdims=True), pred_len, axis=1)
    seasonal_init, trend_init = series_decomp(x_enc, A_enc)
    trend_init = jnp.concatenate([trend_init[:, -label_len:, :], mean], axis=1)
    seasonal_init = jnp.pad(seasonal_init[:, -label_len:, :],
                            ((0, 0), (0, pred_len), (0, 0)))

    d2v_mark = jnp.concatenate([x_mark_enc, x_mark_dec], axis=1)[:, :, 1:3]
    d2v_out = d2v_fourier(jnp.transpose(x_enc, (0, 2, 1)),
                          jnp.transpose(d2v_mark, (0, 2, 1)),
                          params["d2v"], mode)
    d2v_out = jnp.transpose(jnp.sum(d2v_out, axis=-1), (0, 2, 1))  # (B, L_total, F)

    x_enc = x_enc + d2v_out[:, :x_enc.shape[1], :]
    enc_out = data_embedding(x_enc, params["enc_emb"], cfg["d_model"])
    enc_out = encoder_forward(enc_out, params["encoder"], cfg, A_enc)

    seasonal_init = seasonal_init + d2v_out[:, -seasonal_init.shape[1]:, :]
    dec_out = data_embedding(seasonal_init, params["dec_emb"], cfg["d_model"])
    seasonal_part, trend_part = decoder_forward(dec_out, enc_out, trend_init,
                                                params["decoder"], cfg, A_dec)
    dec_out = trend_part + seasonal_part
    return dec_out[:, -pred_len:, :]


# ----------------------------------------------------------------------------
# Deterministic parameter init
# ----------------------------------------------------------------------------
def init_params(key, cfg):
    kit = iter(jax.random.split(key, 256))
    nk = lambda: next(kit)
    dm, dff, H = cfg["d_model"], cfg["d_ff"], cfg["n_heads"]
    F_, co, K = cfg["d_feature"], cfg["c_out"], cfg["T2V_outmodel"]
    E = dm // H

    def linear(din, dout, bias=True):
        lim = 1.0 / math.sqrt(din)
        w = jax.random.uniform(nk(), (din, dout), jnp.float32, -lim, lim)
        b = jax.random.uniform(nk(), (dout,), jnp.float32, -lim, lim) if bias else None
        return w, b

    def conv1x1(cin, cout):
        lim = 1.0 / math.sqrt(cin)
        return jax.random.uniform(nk(), (cin, cout), jnp.float32, -lim, lim)

    def conv3(cin, cout):
        lim = 1.0 / math.sqrt(3 * cin)
        return jax.random.uniform(nk(), (3, cin, cout), jnp.float32, -lim, lim)

    def fourier_w(modes):
        scale = 1.0 / (dm * dm)
        re = jax.random.uniform(nk(), (H, E, E, modes), jnp.float32)
        im = jax.random.uniform(nk(), (H, E, E, modes), jnp.float32)
        return (scale * (re + 1j * im)).astype(jnp.complex64)

    def self_attn_params(modes):
        Wq, bq = linear(dm, dm)
        Wk, bk = linear(dm, dm)
        Wv, bv = linear(dm, dm)
        Wo, bo = linear(dm, dm)
        return dict(Wqkv=jnp.concatenate([Wq, Wk, Wv], axis=1),
                    bqkv=jnp.concatenate([bq, bk, bv], axis=0),
                    Wo=Wo, bo=bo, fw=fourier_w(modes))

    def cross_attn_params(modes):
        Wq, bq = linear(dm, dm)
        Wk, bk = linear(dm, dm)
        Wv, bv = linear(dm, dm)
        Wo, bo = linear(dm, dm)
        return dict(Wq=Wq, bq=bq,
                    Wkv=jnp.concatenate([Wk, Wv], axis=1),
                    bkv=jnp.concatenate([bk, bv], axis=0),
                    Wo=Wo, bo=bo, fw=fourier_w(modes))

    enc_modes = min(cfg["modes"], cfg["seq_len"] // 2)
    dec_len = cfg["label_len"] + cfg["pred_len"]
    dec_modes = min(cfg["modes"], dec_len // 2)
    cross_modes = min(cfg["modes"], min(dec_len // 2, cfg["seq_len"] // 2))

    enc_layers = [dict(attn=self_attn_params(enc_modes),
                       conv1_w=conv1x1(dm, dff),
                       conv2_w=conv1x1(dff, dm))
                  for _ in range(cfg["e_layers"])]
    dec_layers = [dict(self_attn=self_attn_params(dec_modes),
                       cross_attn=cross_attn_params(cross_modes),
                       conv1_w=conv1x1(dm, dff),
                       conv2_w=conv1x1(dff, dm),
                       proj_w=conv3(dm, co))
                  for _ in range(cfg["d_layers"])]

    dec_proj_w, dec_proj_b = linear(dm, co, bias=True)

    return dict(
        enc_emb=dict(tok_w=conv3(F_, dm)),
        dec_emb=dict(tok_w=conv3(F_, dm)),
        d2v=dict(W=0.5 * jax.random.normal(nk(), (F_, 2, K), jnp.float32),
                 b=0.1 * jax.random.normal(nk(), (F_, K), jnp.float32)),
        encoder=dict(layers=enc_layers,
                     norm_g=jnp.ones((dm,), jnp.float32),
                     norm_b=jnp.zeros((dm,), jnp.float32)),
        decoder=dict(layers=dec_layers,
                     norm_g=jnp.ones((dm,), jnp.float32),
                     norm_b=jnp.zeros((dm,), jnp.float32),
                     proj_w=dec_proj_w, proj_b=dec_proj_b),
    )


# ----------------------------------------------------------------------------
if __name__ == "__main__":
    cfg = dict(
        d_feature=4, d_model=16, n_heads=8, d_ff=32,
        e_layers=1, d_layers=1,
        seq_len=16, label_len=8, pred_len=8,
        modes=4, mode_select="low", moving_avg=5,
        c_out=4, T2V_outmodel=8, activation="relu",
    )
    key = jax.random.PRNGKey(0)
    kp, k1, k2, k3, k4 = jax.random.split(key, 5)
    params = init_params(kp, cfg)

    B = 2
    dec_len = cfg["label_len"] + cfg["pred_len"]
    x_enc = jax.random.normal(k1, (B, cfg["seq_len"], cfg["d_feature"]), jnp.float32)
    x_mark_enc = jax.random.normal(k2, (B, cfg["seq_len"], 4), jnp.float32)
    x_dec = jax.random.normal(k3, (B, dec_len, cfg["d_feature"]), jnp.float32)
    x_mark_dec = jax.random.normal(k4, (B, dec_len, 4), jnp.float32)

    fwd = jax.jit(lambda xe, xme, xd, xmd: d2v_fedformer_forward(
        params, cfg, xe, xme, xd, xmd, mode="test"))
    out = fwd(x_enc, x_mark_enc, x_dec, x_mark_dec)
    jax.block_until_ready(out)
    assert out.shape == (B, cfg["pred_len"], cfg["c_out"]), out.shape
    assert bool(jnp.all(jnp.isfinite(out)))
    print("KERNEL_OK")
</pallas_src>

<mosaic_0001>
module attributes {stable_mosaic.version = 11 : i64} {
  func.func @kernel(%arg0: i32, %arg1: i32, %arg2: i32, %arg3: memref<32x16xf32, #tpu.memory_space<vmem>>, %arg4: memref<16x48xbf16, #tpu.memory_space<vmem>>, %arg5: memref<1x48xf32, #tpu.memory_space<vmem>>, %arg6: memref<32x48xf32, #tpu.memory_space<vmem>>) attributes {dimension_semantics = [#tpu.dimension_semantics<parallel>, #tpu.dimension_semantics<parallel>, #tpu.dimension_semantics<arbitrary>], iteration_bounds = array<i64: 1, 1, 1>, scalar_prefetch = 0 : i64, scratch_operands = 0 : i64, tpu.core_type = #tpu.core_type<tc>, window_params = [{transform_indices = @transform_0, window_bounds = array<i64: 32, 16>}, {transform_indices = @transform_1, window_bounds = array<i64: 16, 48>}, {transform_indices = @transform_2, window_bounds = array<i64: 1, 48>}, {transform_indices = @transform_3, window_bounds = array<i64: 32, 48>}]} {
    %c0_i32 = arith.constant 0 : i32
    %0 = arith.cmpi eq, %arg2, %c0_i32 : i32
    %1 = arith.extui %0 : i1 to i32
    %c0_i32_0 = arith.constant 0 : i32
    %2 = arith.cmpi ne, %1, %c0_i32_0 : i32
    scf.if %2 {
      %cst_10 = arith.constant 0.000000e+00 : f32
      %13 = vector.broadcast %cst_10 : f32 to vector<32x48xf32>
      %c0_11 = arith.constant 0 : index
      %c0_12 = arith.constant 0 : index
      %14 = vector.load %arg6[%c0_11, %c0_12] : memref<32x48xf32, #tpu.memory_space<vmem>>, vector<32x48xf32>
      tpu.vector_store %arg6[%c0_11, %c0_12], %13 {strides = array<i32>} : memref<32x48xf32, #tpu.memory_space<vmem>>, vector<32x48xf32>,
    } else {
    }
    %c0 = arith.constant 0 : index
    %c0_1 = arith.constant 0 : index
    %3 = vector.load %arg6[%c0, %c0_1] : memref<32x48xf32, #tpu.memory_space<vmem>>, vector<32x48xf32>
    %c0_2 = arith.constant 0 : index
    %c0_3 = arith.constant 0 : index
    %4 = vector.load %arg3[%c0_2, %c0_3] : memref<32x16xf32, #tpu.memory_space<vmem>>, vector<32x16xf32>
    %5 = arith.truncf %4 : vector<32x16xf32> to vector<32x16xbf16>
    %c0_4 = arith.constant 0 : index
    %c0_5 = arith.constant 0 : index
    %6 = vector.load %arg4[%c0_4, %c0_5] : memref<16x48xbf16, #tpu.memory_space<vmem>>, vector<16x48xbf16>
    %cst = arith.constant dense<0.000000e+00> : vector<32x48xf32>
    %7 = tpu.matmul %5, %6, %cst {dimension_numbers = #tpu.dot_dimension_numbers<[1], [0], [0], [1], [0, 0, 1, 1], [], []>} : vector<32x16xbf16>, vector<16x48xbf16>, vector<32x48xf32> -> vector<32x48xf32>
    %8 = arith.addf %3, %7 : vector<32x48xf32>
    %c0_6 = arith.constant 0 : index
    %c0_7 = arith.constant 0 : index
    %9 = vector.load %arg6[%c0_6, %c0_7] : memref<32x48xf32, #tpu.memory_space<vmem>>, vector<32x48xf32>
    tpu.vector_store %arg6[%c0_6, %c0_7], %8 {strides = array<i32>} : memref<32x48xf32, #tpu.memory_space<vmem>>, vector<32x48xf32>,
    %c0_i32_8 = arith.constant 0 : i32
    %10 = arith.cmpi eq, %arg2, %c0_i32_8 : i32
    %11 = arith.extui %10 : i1 to i32
    %c0_i32_9 = arith.constant 0 : i32
    %12 = arith.cmpi ne, %11, %c0_i32_9 : i32
    scf.if %12 {
      %c0_10 = arith.constant 0 : index
      %c0_11 = arith.constant 0 : index
      %13 = vector.load %arg6[%c0_10, %c0_11] : memref<32x48xf32, #tpu.memory_space<vmem>>, vector<32x48xf32>
      %c0_12 = arith.constant 0 : index
      %c0_13 = arith.constant 0 : index
      %14 = vector.load %arg5[%c0_12, %c0_13] : memref<1x48xf32, #tpu.memory_space<vmem>>, vector<1x48xf32>
      %15 = vector.broadcast %14 : vector<1x48xf32> to vector<32x48xf32>
      %16 = arith.addf %13, %15 : vector<32x48xf32>
      %c0_14 = arith.constant 0 : index
      %c0_15 = arith.constant 0 : index
      %17 = vector.load %arg6[%c0_14, %c0_15] : memref<32x48xf32, #tpu.memory_space<vmem>>, vector<32x48xf32>
      tpu.vector_store %arg6[%c0_14, %c0_15], %16 {strides = array<i32>} : memref<32x48xf32, #tpu.memory_space<vmem>>, vector<32x48xf32>,
    } else {
    }
    return
  }
  func.func @transform_0(%arg0: i32, %arg1: i32, %arg2: i32) -> (i32, i32) {
    %c0_i32 = arith.constant 0 : i32
    return %arg0, %arg2 : i32, i32
  }
  func.func @transform_1(%arg0: i32, %arg1: i32, %arg2: i32) -> (i32, i32) {
    %c0_i32 = arith.constant 0 : i32
    return %arg2, %arg1 : i32, i32
  }
  func.func @transform_2(%arg0: i32, %arg1: i32, %arg2: i32) -> (i32, i32) {
    %c0_i32 = arith.constant 0 : i32
    %c0_i32_0 = arith.constant 0 : i32
    return %c0_i32, %arg1 : i32, i32
  }
  func.func @transform_3(%arg0: i32, %arg1: i32, %arg2: i32) -> (i32, i32) {
    %c0_i32 = arith.constant 0 : i32
    return %arg0, %arg1 : i32, i32
  }
}

module attributes {stable_mosaic.version = 11 : i64} {
  func.func @_decomp_kernel(%arg0: i32, %arg1: i32, %arg2: memref<16x16xbf16, #tpu.memory_space<vmem>>, %arg3: memref<1x16x4xf32, #tpu.memory_space<vmem>>, %arg4: memref<1x16x4xf32, #tpu.memory_space<vmem>>, %arg5: memref<1x16x4xf32, #tpu.memory_space<vmem>>) attributes {dimension_semantics = [#tpu.dimension_semantics<parallel>, #tpu.dimension_semantics<parallel>], iteration_bounds = array<i64: 2, 1>, scalar_prefetch = 0 : i64, scratch_operands = 0 : i64, tpu.core_type = #tpu.core_type<tc>, window_params = [{pipeline_mode = #tpu.pipeline_mode<synchronous>, transform_indices = @transform_0, window_bounds = array<i64: 16, 16>}, {transform_indices = @transform_1, window_bounds = array<i64: 1, 16, 4>}, {transform_indices = @transform_2, window_bounds = array<i64: 1, 16, 4>}, {transform_indices = @transform_3, window_bounds = array<i64: 1, 16, 4>}]} {
    %c0 = arith.constant 0 : index
    %c0_0 = arith.constant 0 : index
    %c0_1 = arith.constant 0 : index
    %0 = vector.load %arg3[%c0, %c0_0, %c0_1] : memref<1x16x4xf32, #tpu.memory_space<vmem>>, vector<1x16x4xf32>
    %1 = vector.shape_cast %0 : vector<1x16x4xf32> to vector<16x4xf32>
    %c0_2 = arith.constant 0 : index
    %c0_3 = arith.constant 0 : index
    %2 = vector.load %arg2[%c0_2, %c0_3] : memref<16x16xbf16, #tpu.memory_space<vmem>>, vector<16x16xbf16>
    %3 = arith.truncf %1 : vector<16x4xf32> to vector<16x4xbf16>
    %cst = arith.constant dense<0.000000e+00> : vector<16x4xf32>
    %4 = tpu.matmul %2, %3, %cst {dimension_numbers = #tpu.dot_dimension_numbers<[1], [0], [0], [1], [0, 0, 1, 1], [], []>} : vector<16x16xbf16>, vector<16x4xbf16>, vector<16x4xf32> -> vector<16x4xf32>
    %c0_4 = arith.constant 0 : index
    %c0_5 = arith.constant 0 : index
    %c0_6 = arith.constant 0 : index
    %5 = vector.load %arg5[%c0_4, %c0_5, %c0_6] : memref<1x16x4xf32, #tpu.memory_space<vmem>>, vector<1x16x4xf32>
    %6 = vector.shape_cast %5 : vector<1x16x4xf32> to vector<16x4xf32>
    %7 = vector.shape_cast %4 : vector<16x4xf32> to vector<1x16x4xf32>
    tpu.vector_store %arg5[%c0_4, %c0_5, %c0_6], %7 {strides = array<i32>} : memref<1x16x4xf32, #tpu.memory_space<vmem>>, vector<1x16x4xf32>,
    %8 = arith.subf %1, %4 : vector<16x4xf32>
    %c0_7 = arith.constant 0 : index
    %c0_8 = arith.constant 0 : index
    %c0_9 = arith.constant 0 : index
    %9 = vector.load %arg4[%c0_7, %c0_8, %c0_9] : memref<1x16x4xf32, #tpu.memory_space<vmem>>, vector<1x16x4xf32>
    %10 = vector.shape_cast %9 : vector<1x16x4xf32> to vector<16x4xf32>
    %11 = vector.shape_cast %8 : vector<16x4xf32> to vector<1x16x4xf32>
    tpu.vector_store %arg4[%c0_7, %c0_8, %c0_9], %11 {strides = array<i32>} : memref<1x16x4xf32, #tpu.memory_space<vmem>>, vector<1x16x4xf32>,
    return
  }
  func.func @transform_0(%arg0: i32, %arg1: i32) -> (i32, i32) {
    %c0_i32 = arith.constant 0 : i32
    %c0_i32_0 = arith.constant 0 : i32
    %c0_i32_1 = arith.constant 0 : i32
    return %c0_i32, %c0_i32_0 : i32, i32
  }
  func.func @transform_1(%arg0: i32, %arg1: i32) -> (i32, i32, i32) {
    %c0_i32 = arith.constant 0 : i32
    %c0_i32_0 = arith.constant 0 : i32
    return %arg0, %c0_i32, %arg1 : i32, i32, i32
  }
  func.func @transform_2(%arg0: i32, %arg1: i32) -> (i32, i32, i32) {
    %c0_i32 = arith.constant 0 : i32
    %c0_i32_0 = arith.constant 0 : i32
    return %arg0, %c0_i32, %arg1 : i32, i32, i32
  }
  func.func @transform_3(%arg0: i32, %arg1: i32) -> (i32, i32, i32) {
    %c0_i32 = arith.constant 0 : i32
    %c0_i32_0 = arith.constant 0 : i32
    return %arg0, %c0_i32, %arg1 : i32, i32, i32
  }
}

module attributes {stable_mosaic.version = 11 : i64} {
  func.func @kernel(%arg0: i32, %arg1: memref<1x16x4xf32, #tpu.memory_space<vmem>>, %arg2: memref<12x16xbf16, #tpu.memory_space<vmem>>, %arg3: memref<16x16xf32, #tpu.memory_space<vmem>>, %arg4: memref<1x16x16xf32, #tpu.memory_space<vmem>>) attributes {dimension_semantics = [#tpu.dimension_semantics<parallel>], iteration_bounds = array<i64: 2>, scalar_prefetch = 0 : i64, scratch_operands = 0 : i64, tpu.core_type = #tpu.core_type<tc>, window_params = [{transform_indices = @transform_0, window_bounds = array<i64: 1, 16, 4>}, {pipeline_mode = #tpu.pipeline_mode<synchronous>, transform_indices = @transform_1, window_bounds = array<i64: 12, 16>}, {pipeline_mode = #tpu.pipeline_mode<synchronous>, transform_indices = @transform_2, window_bounds = array<i64: 16, 16>}, {transform_indices = @transform_3, window_bounds = array<i64: 1, 16, 16>}]} {
    %c0 = arith.constant 0 : index
    %c0_0 = arith.constant 0 : index
    %c0_1 = arith.constant 0 : index
    %0 = vector.load %arg1[%c0, %c0_0, %c0_1] : memref<1x16x4xf32, #tpu.memory_space<vmem>>, vector<1x16x4xf32>
    %1 = vector.shape_cast %0 : vector<1x16x4xf32> to vector<16x4xf32>
    %2 = vector.extract_strided_slice %1 {offsets = [15, 0], sizes = [1, 4], strides = [1, 1]} : vector<16x4xf32> to vector<1x4xf32>
    %3 = vector.extract_strided_slice %1 {offsets = [0, 0], sizes = [15, 4], strides = [1, 1]} : vector<16x4xf32> to vector<15x4xf32>
    %4 = tpu.concatenate %2, %3 in 0 : vector<1x4xf32>, vector<15x4xf32> -> vector<16x4xf32>
    %5 = vector.extract_strided_slice %1 {offsets = [1, 0], sizes = [15, 4], strides = [1, 1]} : vector<16x4xf32> to vector<15x4xf32>
    %6 = vector.extract_strided_slice %1 {offsets = [0, 0], sizes = [1, 4], strides = [1, 1]} : vector<16x4xf32> to vector<1x4xf32>
    %7 = tpu.concatenate %5, %6 in 0 : vector<15x4xf32>, vector<1x4xf32> -> vector<16x4xf32>
    %8 = tpu.concatenate %4, %1, %7 in 1 : vector<16x4xf32>, vector<16x4xf32>, vector<16x4xf32> -> vector<16x12xf32>
    %9 = arith.truncf %8 : vector<16x12xf32> to vector<16x12xbf16>
    %c0_2 = arith.constant 0 : index
    %c0_3 = arith.constant 0 : index
    %10 = vector.load %arg2[%c0_2, %c0_3] : memref<12x16xbf16, #tpu.memory_space<vmem>>, vector<12x16xbf16>
    %cst = arith.constant dense<0.000000e+00> : vector<16x16xf32>
    %11 = tpu.matmul %9, %10, %cst {dimension_numbers = #tpu.dot_dimension_numbers<[1], [0], [0], [1], [0, 0, 1, 1], [], []>} : vector<16x12xbf16>, vector<12x16xbf16>, vector<16x16xf32> -> vector<16x16xf32>
    %c0_4 = arith.constant 0 : index
    %c0_5 = arith.constant 0 : index
    %12 = vector.load %arg3[%c0_4, %c0_5] : memref<16x16xf32, #tpu.memory_space<vmem>>, vector<16x16xf32>
    %13 = arith.addf %11, %12 : vector<16x16xf32>
    %c0_6 = arith.constant 0 : index
    %c0_7 = arith.constant 0 : index
    %c0_8 = arith.constant 0 : index
    %14 = vector.load %arg4[%c0_6, %c0_7, %c0_8] : memref<1x16x16xf32, #tpu.memory_space<vmem>>, vector<1x16x16xf32>
    %15 = vector.shape_cast %14 : vector<1x16x16xf32> to vector<16x16xf32>
    %16 = vector.shape_cast %13 : vector<16x16xf32> to vector<1x16x16xf32>
    tpu.vector_store %arg4[%c0_6, %c0_7, %c0_8], %16 {strides = array<i32>} : memref<1x16x16xf32, #tpu.memory_space<vmem>>, vector<1x16x16xf32>,
    return
  }
  func.func @transform_0(%arg0: i32) -> (i32, i32, i32) {
    %c0_i32 = arith.constant 0 : i32
    %c0_i32_0 = arith.constant 0 : i32
    %c0_i32_1 = arith.constant 0 : i32
    return %arg0, %c0_i32, %c0_i32_0 : i32, i32, i32
  }
  func.func @transform_1(%arg0: i32) -> (i32, i32) {
    %c0_i32 = arith.constant 0 : i32
    %c0_i32_0 = arith.constant 0 : i32
    %c0_i32_1 = arith.constant 0 : i32
    return %c0_i32, %c0_i32_0 : i32, i32
  }
  func.func @transform_2(%arg0: i32) -> (i32, i32) {
    %c0_i32 = arith.constant 0 : i32
    %c0_i32_0 = arith.constant 0 : i32
    %c0_i32_1 = arith.constant 0 : i32
    return %c0_i32, %c0_i32_0 : i32, i32
  }
  func.func @transform_3(%arg0: i32) -> (i32, i32, i32) {
    %c0_i32 = arith.constant 0 : i32
    %c0_i32_0 = arith.constant 0 : i32
    %c0_i32_1 = arith.constant 0 : i32
    return %arg0, %c0_i32, %c0_i32_0 : i32, i32, i32
  }
}

module attributes {stable_mosaic.version = 11 : i64} {
  func.func @_decomp_add_kernel(%arg0: i32, %arg1: i32, %arg2: memref<16x16xbf16, #tpu.memory_space<vmem>>, %arg3: memref<1x16x16xf32, #tpu.memory_space<vmem>>, %arg4: memref<1x16x16xf32, #tpu.memory_space<vmem>>, %arg5: memref<1x16x16xf32, #tpu.memory_space<vmem>>, %arg6: memref<1x16x16xf32, #tpu.memory_space<vmem>>) attributes {dimension_semantics = [#tpu.dimension_semantics<parallel>, #tpu.dimension_semantics<parallel>], iteration_bounds = array<i64: 2, 1>, scalar_prefetch = 0 : i64, scratch_operands = 0 : i64, tpu.core_type = #tpu.core_type<tc>, window_params = [{pipeline_mode = #tpu.pipeline_mode<synchronous>, transform_indices = @transform_0, window_bounds = array<i64: 16, 16>}, {transform_indices = @transform_1, window_bounds = array<i64: 1, 16, 16>}, {transform_indices = @transform_2, window_bounds = array<i64: 1, 16, 16>}, {transform_indices = @transform_3, window_bounds = array<i64: 1, 16, 16>}, {transform_indices = @transform_4, window_bounds = array<i64: 1, 16, 16>}]} {
    %c0 = arith.constant 0 : index
    %c0_0 = arith.constant 0 : index
    %c0_1 = arith.constant 0 : index
    %0 = vector.load %arg3[%c0, %c0_0, %c0_1] : memref<1x16x16xf32, #tpu.memory_space<vmem>>, vector<1x16x16xf32>
    %1 = vector.shape_cast %0 : vector<1x16x16xf32> to vector<16x16xf32>
    %c0_2 = arith.constant 0 : index
    %c0_3 = arith.constant 0 : index
    %c0_4 = arith.constant 0 : index
    %2 = vector.load %arg4[%c0_2, %c0_3, %c0_4] : memref<1x16x16xf32, #tpu.memory_space<vmem>>, vector<1x16x16xf32>
    %3 = vector.shape_cast %2 : vector<1x16x16xf32> to vector<16x16xf32>
    %4 = arith.addf %1, %3 : vector<16x16xf32>
    %c0_5 = arith.constant 0 : index
    %c0_6 = arith.constant 0 : index
    %5 = vector.load %arg2[%c0_5, %c0_6] : memref<16x16xbf16, #tpu.memory_space<vmem>>, vector<16x16xbf16>
    %6 = arith.truncf %4 : vector<16x16xf32> to vector<16x16xbf16>
    %cst = arith.constant dense<0.000000e+00> : vector<16x16xf32>
    %7 = tpu.matmul %5, %6, %cst {dimension_numbers = #tpu.dot_dimension_numbers<[1], [0], [0], [1], [0, 0, 1, 1], [], []>} : vector<16x16xbf16>, vector<16x16xbf16>, vector<16x16xf32> -> vector<16x16xf32>
    %c0_7 = arith.constant 0 : index
    %c0_8 = arith.constant 0 : index
    %c0_9 = arith.constant 0 : index
    %8 = vector.load %arg6[%c0_7, %c0_8, %c0_9] : memref<1x16x16xf32, #tpu.memory_space<vmem>>, vector<1x16x16xf32>
    %9 = vector.shape_cast %8 : vector<1x16x16xf32> to vector<16x16xf32>
    %10 = vector.shape_cast %7 : vector<16x16xf32> to vector<1x16x16xf32>
    tpu.vector_store %arg6[%c0_7, %c0_8, %c0_9], %10 {strides = array<i32>} : memref<1x16x16xf32, #tpu.memory_space<vmem>>, vector<1x16x16xf32>,
    %11 = arith.subf %4, %7 : vector<16x16xf32>
    %c0_10 = arith.constant 0 : index
    %c0_11 = arith.constant 0 : index
    %c0_12 = arith.constant 0 : index
    %12 = vector.load %arg5[%c0_10, %c0_11, %c0_12] : memref<1x16x16xf32, #tpu.memory_space<vmem>>, vector<1x16x16xf32>
    %13 = vector.shape_cast %12 : vector<1x16x16xf32> to vector<16x16xf32>
    %14 = vector.shape_cast %11 : vector<16x16xf32> to vector<1x16x16xf32>
    tpu.vector_store %arg5[%c0_10, %c0_11, %c0_12], %14 {strides = array<i32>} : memref<1x16x16xf32, #tpu.memory_space<vmem>>, vector<1x16x16xf32>,
    return
  }
  func.func @transform_0(%arg0: i32, %arg1: i32) -> (i32, i32) {
    %c0_i32 = arith.constant 0 : i32
    %c0_i32_0 = arith.constant 0 : i32
    %c0_i32_1 = arith.constant 0 : i32
    return %c0_i32, %c0_i32_0 : i32, i32
  }
  func.func @transform_1(%arg0: i32, %arg1: i32) -> (i32, i32, i32) {
    %c0_i32 = arith.constant 0 : i32
    %c0_i32_0 = arith.constant 0 : i32
    return %arg0, %c0_i32, %arg1 : i32, i32, i32
  }
  func.func @transform_2(%arg0: i32, %arg1: i32) -> (i32, i32, i32) {
    %c0_i32 = arith.constant 0 : i32
    %c0_i32_0 = arith.constant 0 : i32
    return %arg0, %c0_i32, %arg1 : i32, i32, i32
  }
  func.func @transform_3(%arg0: i32, %arg1: i32) -> (i32, i32, i32) {
    %c0_i32 = arith.constant 0 : i32
    %c0_i32_0 = arith.constant 0 : i32
    return %arg0, %c0_i32, %arg1 : i32, i32, i32
  }
  func.func @transform_4(%arg0: i32, %arg1: i32) -> (i32, i32, i32) {
    %c0_i32 = arith.constant 0 : i32
    %c0_i32_0 = arith.constant 0 : i32
    return %arg0, %c0_i32, %arg1 : i32, i32, i32
  }
}

module attributes {stable_mosaic.version = 11 : i64} {
  func.func @kernel(%arg0: i32, %arg1: i32, %arg2: i32, %arg3: memref<32x16xf32, #tpu.memory_space<vmem>>, %arg4: memref<16x16xbf16, #tpu.memory_space<vmem>>, %arg5: memref<1x16xf32, #tpu.memory_space<vmem>>, %arg6: memref<32x16xf32, #tpu.memory_space<vmem>>) attributes {dimension_semantics = [#tpu.dimension_semantics<parallel>, #tpu.dimension_semantics<parallel>, #tpu.dimension_semantics<arbitrary>], iteration_bounds = array<i64: 1, 1, 1>, scalar_prefetch = 0 : i64, scratch_operands = 0 : i64, tpu.core_type = #tpu.core_type<tc>, window_params = [{transform_indices = @transform_0, window_bounds = array<i64: 32, 16>}, {transform_indices = @transform_1, window_bounds = array<i64: 16, 16>}, {transform_indices = @transform_2, window_bounds = array<i64: 1, 16>}, {transform_indices = @transform_3, window_bounds = array<i64: 32, 16>}]} {
    %c0_i32 = arith.constant 0 : i32
    %0 = arith.cmpi eq, %arg2, %c0_i32 : i32
    %1 = arith.extui %0 : i1 to i32
    %c0_i32_0 = arith.constant 0 : i32
    %2 = arith.cmpi ne, %1, %c0_i32_0 : i32
    scf.if %2 {
      %cst_10 = arith.constant 0.000000e+00 : f32
      %13 = vector.broadcast %cst_10 : f32 to vector<32x16xf32>
      %c0_11 = arith.constant 0 : index
      %c0_12 = arith.constant 0 : index
      %14 = vector.load %arg6[%c0_11, %c0_12] : memref<32x16xf32, #tpu.memory_space<vmem>>, vector<32x16xf32>
      tpu.vector_store %arg6[%c0_11, %c0_12], %13 {strides = array<i32>} : memref<32x16xf32, #tpu.memory_space<vmem>>, vector<32x16xf32>,
    } else {
    }
    %c0 = arith.constant 0 : index
    %c0_1 = arith.constant 0 : index
    %3 = vector.load %arg6[%c0, %c0_1] : memref<32x16xf32, #tpu.memory_space<vmem>>, vector<32x16xf32>
    %c0_2 = arith.constant 0 : index
    %c0_3 = arith.constant 0 : index
    %4 = vector.load %arg3[%c0_2, %c0_3] : memref<32x16xf32, #tpu.memory_space<vmem>>, vector<32x16xf32>
    %5 = arith.truncf %4 : vector<32x16xf32> to vector<32x16xbf16>
    %c0_4 = arith.constant 0 : index
    %c0_5 = arith.constant 0 : index
    %6 = vector.load %arg4[%c0_4, %c0_5] : memref<16x16xbf16, #tpu.memory_space<vmem>>, vector<16x16xbf16>
    %cst = arith.constant dense<0.000000e+00> : vector<32x16xf32>
    %7 = tpu.matmul %5, %6, %cst {dimension_numbers = #tpu.dot_dimension_numbers<[1], [0], [0], [1], [0, 0, 1, 1], [], []>} : vector<32x16xbf16>, vector<16x16xbf16>, vector<32x16xf32> -> vector<32x16xf32>
    %8 = arith.addf %3, %7 : vector<32x16xf32>
    %c0_6 = arith.constant 0 : index
    %c0_7 = arith.constant 0 : index
    %9 = vector.load %arg6[%c0_6, %c0_7] : memref<32x16xf32, #tpu.memory_space<vmem>>, vector<32x16xf32>
    tpu.vector_store %arg6[%c0_6, %c0_7], %8 {strides = array<i32>} : memref<32x16xf32, #tpu.memory_space<vmem>>, vector<32x16xf32>,
    %c0_i32_8 = arith.constant 0 : i32
    %10 = arith.cmpi eq, %arg2, %c0_i32_8 : i32
    %11 = arith.extui %10 : i1 to i32
    %c0_i32_9 = arith.constant 0 : i32
    %12 = arith.cmpi ne, %11, %c0_i32_9 : i32
    scf.if %12 {
      %c0_10 = arith.constant 0 : index
      %c0_11 = arith.constant 0 : index
      %13 = vector.load %arg6[%c0_10, %c0_11] : memref<32x16xf32, #tpu.memory_space<vmem>>, vector<32x16xf32>
      %c0_12 = arith.constant 0 : index
      %c0_13 = arith.constant 0 : index
      %14 = vector.load %arg5[%c0_12, %c0_13] : memref<1x16xf32, #tpu.memory_space<vmem>>, vector<1x16xf32>
      %15 = vector.broadcast %14 : vector<1x16xf32> to vector<32x16xf32>
      %16 = arith.addf %13, %15 : vector<32x16xf32>
      %c0_14 = arith.constant 0 : index
      %c0_15 = arith.constant 0 : index
      %17 = vector.load %arg6[%c0_14, %c0_15] : memref<32x16xf32, #tpu.memory_space<vmem>>, vector<32x16xf32>
      tpu.vector_store %arg6[%c0_14, %c0_15], %16 {strides = array<i32>} : memref<32x16xf32, #tpu.memory_space<vmem>>, vector<32x16xf32>,
    } else {
    }
    return
  }
  func.func @transform_0(%arg0: i32, %arg1: i32, %arg2: i32) -> (i32, i32) {
    %c0_i32 = arith.constant 0 : i32
    return %arg0, %arg2 : i32, i32
  }
  func.func @transform_1(%arg0: i32, %arg1: i32, %arg2: i32) -> (i32, i32) {
    %c0_i32 = arith.constant 0 : i32
    return %arg2, %arg1 : i32, i32
  }
  func.func @transform_2(%arg0: i32, %arg1: i32, %arg2: i32) -> (i32, i32) {
    %c0_i32 = arith.constant 0 : i32
    %c0_i32_0 = arith.constant 0 : i32
    return %c0_i32, %arg1 : i32, i32
  }
  func.func @transform_3(%arg0: i32, %arg1: i32, %arg2: i32) -> (i32, i32) {
    %c0_i32 = arith.constant 0 : i32
    return %arg0, %arg1 : i32, i32
  }
}

module attributes {stable_mosaic.version = 11 : i64} {
  func.func @_mylayernorm_kernel(%arg0: i32, %arg1: memref<1x16x16xf32, #tpu.memory_space<vmem>>, %arg2: memref<1x16xf32, #tpu.memory_space<vmem>>, %arg3: memref<1x16xf32, #tpu.memory_space<vmem>>, %arg4: memref<1x16x16xf32, #tpu.memory_space<vmem>>) attributes {dimension_semantics = [#tpu.dimension_semantics<parallel>], iteration_bounds = array<i64: 2>, scalar_prefetch = 0 : i64, scratch_operands = 0 : i64, tpu.core_type = #tpu.core_type<tc>, window_params = [{transform_indices = @transform_0, window_bounds = array<i64: 1, 16, 16>}, {pipeline_mode = #tpu.pipeline_mode<synchronous>, transform_indices = @transform_1, window_bounds = array<i64: 1, 16>}, {pipeline_mode = #tpu.pipeline_mode<synchronous>, transform_indices = @transform_2, window_bounds = array<i64: 1, 16>}, {transform_indices = @transform_3, window_bounds = array<i64: 1, 16, 16>}]} {
    %c0 = arith.constant 0 : index
    %c0_0 = arith.constant 0 : index
    %c0_1 = arith.constant 0 : index
    %0 = vector.load %arg1[%c0, %c0_0, %c0_1] : memref<1x16x16xf32, #tpu.memory_space<vmem>>, vector<1x16x16xf32>
    %1 = vector.shape_cast %0 : vector<1x16x16xf32> to vector<16x16xf32>
    %cst = arith.constant dense<0.000000e+00> : vector<16xf32>
    %2 = vector.multi_reduction <add>, %1, %cst [1] : vector<16x16xf32> to vector<16xf32>
    %3 = vector.shape_cast %2 : vector<16xf32> to vector<16x1xf32>
    %cst_2 = arith.constant 1.600000e+01 : f32
    %4 = vector.broadcast %cst_2 : f32 to vector<16x1xf32>
    %5 = arith.divf %3, %4 : vector<16x1xf32>
    %6 = vector.broadcast %5 : vector<16x1xf32> to vector<16x16xf32>
    %7 = arith.subf %1, %6 : vector<16x16xf32>
    %8 = arith.mulf %7, %7 : vector<16x16xf32>
    %cst_3 = arith.constant dense<0.000000e+00> : vector<16xf32>
    %9 = vector.multi_reduction <add>, %8, %cst_3 [1] : vector<16x16xf32> to vector<16xf32>
    %10 = vector.shape_cast %9 : vector<16xf32> to vector<16x1xf32>
    %cst_4 = arith.constant 1.600000e+01 : f32
    %11 = vector.broadcast %cst_4 : f32 to vector<16x1xf32>
    %12 = arith.divf %10, %11 : vector<16x1xf32>
    %cst_5 = arith.constant 9.99999974E-6 : f32
    %13 = vector.broadcast %cst_5 : f32 to vector<16x1xf32>
    %14 = arith.addf %12, %13 : vector<16x1xf32>
    %15 = math.rsqrt %14 : vector<16x1xf32>
    %16 = vector.broadcast %15 : vector<16x1xf32> to vector<16x16xf32>
    %17 = arith.mulf %7, %16 : vector<16x16xf32>
    %c0_6 = arith.constant 0 : index
    %c0_7 = arith.constant 0 : index
    %18 = vector.load %arg2[%c0_6, %c0_7] : memref<1x16xf32, #tpu.memory_space<vmem>>, vector<1x16xf32>
    %19 = vector.broadcast %18 : vector<1x16xf32> to vector<16x16xf32>
    %20 = arith.mulf %17, %19 : vector<16x16xf32>
    %c0_8 = arith.constant 0 : index
    %c0_9 = arith.constant 0 : index
    %21 = vector.load %arg3[%c0_8, %c0_9] : memref<1x16xf32, #tpu.memory_space<vmem>>, vector<1x16xf32>
    %22 = vector.broadcast %21 : vector<1x16xf32> to vector<16x16xf32>
    %23 = arith.addf %20, %22 : vector<16x16xf32>
    %cst_10 = arith.constant dense<0.000000e+00> : vector<16xf32>
    %24 = vector.multi_reduction <add>, %23, %cst_10 [0] : vector<16x16xf32> to vector<16xf32>
    %25 = vector.shape_cast %24 : vector<16xf32> to vector<1x16xf32>
    %cst_11 = arith.constant 1.600000e+01 : f32
    %26 = vector.broadcast %cst_11 : f32 to vector<1x16xf32>
    %27 = arith.divf %25, %26 : vector<1x16xf32>
    %28 = vector.broadcast %27 : vector<1x16xf32> to vector<16x16xf32>
    %29 = arith.subf %23, %28 : vector<16x16xf32>
    %c0_12 = arith.constant 0 : index
    %c0_13 = arith.constant 0 : index
    %c0_14 = arith.constant 0 : index
    %30 = vector.load %arg4[%c0_12, %c0_13, %c0_14] : memref<1x16x16xf32, #tpu.memory_space<vmem>>, vector<1x16x16xf32>
    %31 = vector.shape_cast %30 : vector<1x16x16xf32> to vector<16x16xf32>
    %32 = vector.shape_cast %29 : vector<16x16xf32> to vector<1x16x16xf32>
    tpu.vector_store %arg4[%c0_12, %c0_13, %c0_14], %32 {strides = array<i32>} : memref<1x16x16xf32, #tpu.memory_space<vmem>>, vector<1x16x16xf32>,
    return
  }
  func.func @transform_0(%arg0: i32) -> (i32, i32, i32) {
    %c0_i32 = arith.constant 0 : i32
    %c0_i32_0 = arith.constant 0 : i32
    %c0_i32_1 = arith.constant 0 : i32
    return %arg0, %c0_i32, %c0_i32_0 : i32, i32, i32
  }
  func.func @transform_1(%arg0: i32) -> (i32, i32) {
    %c0_i32 = arith.constant 0 : i32
    %c0_i32_0 = arith.constant 0 : i32
    %c0_i32_1 = arith.constant 0 : i32
    return %c0_i32, %c0_i32_0 : i32, i32
  }
  func.func @transform_2(%arg0: i32) -> (i32, i32) {
    %c0_i32 = arith.constant 0 : i32
    %c0_i32_0 = arith.constant 0 : i32
    %c0_i32_1 = arith.constant 0 : i32
    return %c0_i32, %c0_i32_0 : i32, i32
  }
  func.func @transform_3(%arg0: i32) -> (i32, i32, i32) {
    %c0_i32 = arith.constant 0 : i32
    %c0_i32_0 = arith.constant 0 : i32
    %c0_i32_1 = arith.constant 0 : i32
    return %arg0, %c0_i32, %c0_i32_0 : i32, i32, i32
  }
}

module attributes {stable_mosaic.version = 11 : i64} {
  func.func @kernel(%arg0: i32, %arg1: memref<16x16xbf16, #tpu.memory_space<vmem>>, %arg2: memref<1x16x16xf32, #tpu.memory_space<vmem>>, %arg3: memref<16x32xbf16, #tpu.memory_space<vmem>>, %arg4: memref<32x16xbf16, #tpu.memory_space<vmem>>, %arg5: memref<1x16x16xf32, #tpu.memory_space<vmem>>, %arg6: memref<1x16x16xf32, #tpu.memory_space<vmem>>) attributes {dimension_semantics = [#tpu.dimension_semantics<parallel>], iteration_bounds = array<i64: 2>, scalar_prefetch = 0 : i64, scratch_operands = 0 : i64, tpu.core_type = #tpu.core_type<tc>, window_params = [{pipeline_mode = #tpu.pipeline_mode<synchronous>, transform_indices = @transform_0, window_bounds = array<i64: 16, 16>}, {transform_indices = @transform_1, window_bounds = array<i64: 1, 16, 16>}, {pipeline_mode = #tpu.pipeline_mode<synchronous>, transform_indices = @transform_2, window_bounds = array<i64: 16, 32>}, {pipeline_mode = #tpu.pipeline_mode<synchronous>, transform_indices = @transform_3, window_bounds = array<i64: 32, 16>}, {transform_indices = @transform_4, window_bounds = array<i64: 1, 16, 16>}, {transform_indices = @transform_5, window_bounds = array<i64: 1, 16, 16>}]} {
    %c0 = arith.constant 0 : index
    %c0_0 = arith.constant 0 : index
    %c0_1 = arith.constant 0 : index
    %0 = vector.load %arg2[%c0, %c0_0, %c0_1] : memref<1x16x16xf32, #tpu.memory_space<vmem>>, vector<1x16x16xf32>
    %1 = vector.shape_cast %0 : vector<1x16x16xf32> to vector<16x16xf32>
    %2 = arith.truncf %1 : vector<16x16xf32> to vector<16x16xbf16>
    %c0_2 = arith.constant 0 : index
    %c0_3 = arith.constant 0 : index
    %3 = vector.load %arg3[%c0_2, %c0_3] : memref<16x32xbf16, #tpu.memory_space<vmem>>, vector<16x32xbf16>
    %cst = arith.constant dense<0.000000e+00> : vector<16x32xf32>
    %4 = tpu.matmul %2, %3, %cst {dimension_numbers = #tpu.dot_dimension_numbers<[1], [0], [0], [1], [0, 0, 1, 1], [], []>} : vector<16x16xbf16>, vector<16x32xbf16>, vector<16x32xf32> -> vector<16x32xf32>
    %cst_4 = arith.constant 0.000000e+00 : f32
    %5 = vector.broadcast %cst_4 : f32 to vector<16x32xf32>
    %6 = arith.maximumf %4, %5 : vector<16x32xf32>
    %7 = arith.truncf %6 : vector<16x32xf32> to vector<16x32xbf16>
    %c0_5 = arith.constant 0 : index
    %c0_6 = arith.constant 0 : index
    %8 = vector.load %arg4[%c0_5, %c0_6] : memref<32x16xbf16, #tpu.memory_space<vmem>>, vector<32x16xbf16>
    %cst_7 = arith.constant dense<0.000000e+00> : vector<16x16xf32>
    %9 = tpu.matmul %7, %8, %cst_7 {dimension_numbers = #tpu.dot_dimension_numbers<[1], [0], [0], [1], [0, 0, 1, 1], [], []>} : vector<16x32xbf16>, vector<32x16xbf16>, vector<16x16xf32> -> vector<16x16xf32>
    %10 = arith.addf %1, %9 : vector<16x16xf32>
    %c0_8 = arith.constant 0 : index
    %c0_9 = arith.constant 0 : index
    %11 = vector.load %arg1[%c0_8, %c0_9] : memref<16x16xbf16, #tpu.memory_space<vmem>>, vector<16x16xbf16>
    %12 = arith.truncf %10 : vector<16x16xf32> to vector<16x16xbf16>
    %cst_10 = arith.constant dense<0.000000e+00> : vector<16x16xf32>
    %13 = tpu.matmul %11, %12, %cst_10 {dimension_numbers = #tpu.dot_dimension_numbers<[1], [0], [0], [1], [0, 0, 1, 1], [], []>} : vector<16x16xbf16>, vector<16x16xbf16>, vector<16x16xf32> -> vector<16x16xf32>
    %c0_11 = arith.constant 0 : index
    %c0_12 = arith.constant 0 : index
    %c0_13 = arith.constant 0 : index
    %14 = vector.load %arg6[%c0_11, %c0_12, %c0_13] : memref<1x16x16xf32, #tpu.memory_space<vmem>>, vector<1x16x16xf32>
    %15 = vector.shape_cast %14 : vector<1x16x16xf32> to vector<16x16xf32>
    %16 = vector.shape_cast %13 : vector<16x16xf32> to vector<1x16x16xf32>
    tpu.vector_store %arg6[%c0_11, %c0_12, %c0_13], %16 {strides = array<i32>} : memref<1x16x16xf32, #tpu.memory_space<vmem>>, vector<1x16x16xf32>,
    %17 = arith.subf %10, %13 : vector<16x16xf32>
    %c0_14 = arith.constant 0 : index
    %c0_15 = arith.constant 0 : index
    %c0_16 = arith.constant 0 : index
    %18 = vector.load %arg5[%c0_14, %c0_15, %c0_16] : memref<1x16x16xf32, #tpu.memory_space<vmem>>, vector<1x16x16xf32>
    %19 = vector.shape_cast %18 : vector<1x16x16xf32> to vector<16x16xf32>
    %20 = vector.shape_cast %17 : vector<16x16xf32> to vector<1x16x16xf32>
    tpu.vector_store %arg5[%c0_14, %c0_15, %c0_16], %20 {strides = array<i32>} : memref<1x16x16xf32, #tpu.memory_space<vmem>>, vector<1x16x16xf32>,
    return
  }
  func.func @transform_0(%arg0: i32) -> (i32, i32) {
    %c0_i32 = arith.constant 0 : i32
    %c0_i32_0 = arith.constant 0 : i32
    %c0_i32_1 = arith.constant 0 : i32
    return %c0_i32, %c0_i32_0 : i32, i32
  }
  func.func @transform_1(%arg0: i32) -> (i32, i32, i32) {
    %c0_i32 = arith.constant 0 : i32
    %c0_i32_0 = arith.constant 0 : i32
    %c0_i32_1 = arith.constant 0 : i32
    return %arg0, %c0_i32, %c0_i32_0 : i32, i32, i32
  }
  func.func @transform_2(%arg0: i32) -> (i32, i32) {
    %c0_i32 = arith.constant 0 : i32
    %c0_i32_0 = arith.constant 0 : i32
    %c0_i32_1 = arith.constant 0 : i32
    return %c0_i32, %c0_i32_0 : i32, i32
  }
  func.func @transform_3(%arg0: i32) -> (i32, i32) {
    %c0_i32 = arith.constant 0 : i32
    %c0_i32_0 = arith.constant 0 : i32
    %c0_i32_1 = arith.constant 0 : i32
    return %c0_i32, %c0_i32_0 : i32, i32
  }
  func.func @transform_4(%arg0: i32) -> (i32, i32, i32) {
    %c0_i32 = arith.constant 0 : i32
    %c0_i32_0 = arith.constant 0 : i32
    %c0_i32_1 = arith.constant 0 : i32
    return %arg0, %c0_i32, %c0_i32_0 : i32, i32, i32
  }
  func.func @transform_5(%arg0: i32) -> (i32, i32, i32) {
    %c0_i32 = arith.constant 0 : i32
    %c0_i32_0 = arith.constant 0 : i32
    %c0_i32_1 = arith.constant 0 : i32
    return %arg0, %c0_i32, %c0_i32_0 : i32, i32, i32
  }
}

module attributes {stable_mosaic.version = 11 : i64} {
  func.func @kernel(%arg0: i32, %arg1: i32, %arg2: i32, %arg3: memref<32x16xf32, #tpu.memory_space<vmem>>, %arg4: memref<16x32xbf16, #tpu.memory_space<vmem>>, %arg5: memref<1x32xf32, #tpu.memory_space<vmem>>, %arg6: memref<32x32xf32, #tpu.memory_space<vmem>>) attributes {dimension_semantics = [#tpu.dimension_semantics<parallel>, #tpu.dimension_semantics<parallel>, #tpu.dimension_semantics<arbitrary>], iteration_bounds = array<i64: 1, 1, 1>, scalar_prefetch = 0 : i64, scratch_operands = 0 : i64, tpu.core_type = #tpu.core_type<tc>, window_params = [{transform_indices = @transform_0, window_bounds = array<i64: 32, 16>}, {transform_indices = @transform_1, window_bounds = array<i64: 16, 32>}, {transform_indices = @transform_2, window_bounds = array<i64: 1, 32>}, {transform_indices = @transform_3, window_bounds = array<i64: 32, 32>}]} {
    %c0_i32 = arith.constant 0 : i32
    %0 = arith.cmpi eq, %arg2, %c0_i32 : i32
    %1 = arith.extui %0 : i1 to i32
    %c0_i32_0 = arith.constant 0 : i32
    %2 = arith.cmpi ne, %1, %c0_i32_0 : i32
    scf.if %2 {
      %cst_10 = arith.constant 0.000000e+00 : f32
      %13 = vector.broadcast %cst_10 : f32 to vector<32x32xf32>
      %c0_11 = arith.constant 0 : index
      %c0_12 = arith.constant 0 : index
      %14 = vector.load %arg6[%c0_11, %c0_12] : memref<32x32xf32, #tpu.memory_space<vmem>>, vector<32x32xf32>
      tpu.vector_store %arg6[%c0_11, %c0_12], %13 {strides = array<i32>} : memref<32x32xf32, #tpu.memory_space<vmem>>, vector<32x32xf32>,
    } else {
    }
    %c0 = arith.constant 0 : index
    %c0_1 = arith.constant 0 : index
    %3 = vector.load %arg6[%c0, %c0_1] : memref<32x32xf32, #tpu.memory_space<vmem>>, vector<32x32xf32>
    %c0_2 = arith.constant 0 : index
    %c0_3 = arith.constant 0 : index
    %4 = vector.load %arg3[%c0_2, %c0_3] : memref<32x16xf32, #tpu.memory_space<vmem>>, vector<32x16xf32>
    %5 = arith.truncf %4 : vector<32x16xf32> to vector<32x16xbf16>
    %c0_4 = arith.constant 0 : index
    %c0_5 = arith.constant 0 : index
    %6 = vector.load %arg4[%c0_4, %c0_5] : memref<16x32xbf16, #tpu.memory_space<vmem>>, vector<16x32xbf16>
    %cst = arith.constant dense<0.000000e+00> : vector<32x32xf32>
    %7 = tpu.matmul %5, %6, %cst {dimension_numbers = #tpu.dot_dimension_numbers<[1], [0], [0], [1], [0, 0, 1, 1], [], []>} : vector<32x16xbf16>, vector<16x32xbf16>, vector<32x32xf32> -> vector<32x32xf32>
    %8 = arith.addf %3, %7 : vector<32x32xf32>
    %c0_6 = arith.constant 0 : index
    %c0_7 = arith.constant 0 : index
    %9 = vector.load %arg6[%c0_6, %c0_7] : memref<32x32xf32, #tpu.memory_space<vmem>>, vector<32x32xf32>
    tpu.vector_store %arg6[%c0_6, %c0_7], %8 {strides = array<i32>} : memref<32x32xf32, #tpu.memory_space<vmem>>, vector<32x32xf32>,
    %c0_i32_8 = arith.constant 0 : i32
    %10 = arith.cmpi eq, %arg2, %c0_i32_8 : i32
    %11 = arith.extui %10 : i1 to i32
    %c0_i32_9 = arith.constant 0 : i32
    %12 = arith.cmpi ne, %11, %c0_i32_9 : i32
    scf.if %12 {
      %c0_10 = arith.constant 0 : index
      %c0_11 = arith.constant 0 : index
      %13 = vector.load %arg6[%c0_10, %c0_11] : memref<32x32xf32, #tpu.memory_space<vmem>>, vector<32x32xf32>
      %c0_12 = arith.constant 0 : index
      %c0_13 = arith.constant 0 : index
      %14 = vector.load %arg5[%c0_12, %c0_13] : memref<1x32xf32, #tpu.memory_space<vmem>>, vector<1x32xf32>
      %15 = vector.broadcast %14 : vector<1x32xf32> to vector<32x32xf32>
      %16 = arith.addf %13, %15 : vector<32x32xf32>
      %c0_14 = arith.constant 0 : index
      %c0_15 = arith.constant 0 : index
      %17 = vector.load %arg6[%c0_14, %c0_15] : memref<32x32xf32, #tpu.memory_space<vmem>>, vector<32x32xf32>
      tpu.vector_store %arg6[%c0_14, %c0_15], %16 {strides = array<i32>} : memref<32x32xf32, #tpu.memory_space<vmem>>, vector<32x32xf32>,
    } else {
    }
    return
  }
  func.func @transform_0(%arg0: i32, %arg1: i32, %arg2: i32) -> (i32, i32) {
    %c0_i32 = arith.constant 0 : i32
    return %arg0, %arg2 : i32, i32
  }
  func.func @transform_1(%arg0: i32, %arg1: i32, %arg2: i32) -> (i32, i32) {
    %c0_i32 = arith.constant 0 : i32
    return %arg2, %arg1 : i32, i32
  }
  func.func @transform_2(%arg0: i32, %arg1: i32, %arg2: i32) -> (i32, i32) {
    %c0_i32 = arith.constant 0 : i32
    %c0_i32_0 = arith.constant 0 : i32
    return %c0_i32, %arg1 : i32, i32
  }
  func.func @transform_3(%arg0: i32, %arg1: i32, %arg2: i32) -> (i32, i32) {
    %c0_i32 = arith.constant 0 : i32
    return %arg0, %arg1 : i32, i32
  }
}

module attributes {stable_mosaic.version = 11 : i64} {
  func.func @_decomp_add_kernel(%arg0: i32, %arg1: i32, %arg2: memref<16x16xbf16, #tpu.memory_space<vmem>>, %arg3: memref<1x16x16xf32, #tpu.memory_space<vmem>>, %arg4: memref<1x16x16xf32, #tpu.memory_space<vmem>>, %arg5: memref<1x16x16xf32, #tpu.memory_space<vmem>>, %arg6: memref<1x16x16xf32, #tpu.memory_space<vmem>>) attributes {dimension_semantics = [#tpu.dimension_semantics<parallel>, #tpu.dimension_semantics<parallel>], iteration_bounds = array<i64: 2, 1>, scalar_prefetch = 0 : i64, scratch_operands = 0 : i64, tpu.core_type = #tpu.core_type<tc>, window_params = [{pipeline_mode = #tpu.pipeline_mode<synchronous>, transform_indices = @transform_0, window_bounds = array<i64: 16, 16>}, {transform_indices = @transform_1, window_bounds = array<i64: 1, 16, 16>}, {transform_indices = @transform_2, window_bounds = array<i64: 1, 16, 16>}, {transform_indices = @transform_3, window_bounds = array<i64: 1, 16, 16>}, {transform_indices = @transform_4, window_bounds = array<i64: 1, 16, 16>}]} {
    %c0 = arith.constant 0 : index
    %c0_0 = arith.constant 0 : index
    %c0_1 = arith.constant 0 : index
    %0 = vector.load %arg3[%c0, %c0_0, %c0_1] : memref<1x16x16xf32, #tpu.memory_space<vmem>>, vector<1x16x16xf32>
    %1 = vector.shape_cast %0 : vector<1x16x16xf32> to vector<16x16xf32>
    %c0_2 = arith.constant 0 : index
    %c0_3 = arith.constant 0 : index
    %c0_4 = arith.constant 0 : index
    %2 = vector.load %arg4[%c0_2, %c0_3, %c0_4] : memref<1x16x16xf32, #tpu.memory_space<vmem>>, vector<1x16x16xf32>
    %3 = vector.shape_cast %2 : vector<1x16x16xf32> to vector<16x16xf32>
    %4 = arith.addf %1, %3 : vector<16x16xf32>
    %c0_5 = arith.constant 0 : index
    %c0_6 = arith.constant 0 : index
    %5 = vector.load %arg2[%c0_5, %c0_6] : memref<16x16xbf16, #tpu.memory_space<vmem>>, vector<16x16xbf16>
    %6 = arith.truncf %4 : vector<16x16xf32> to vector<16x16xbf16>
    %cst = arith.constant dense<0.000000e+00> : vector<16x16xf32>
    %7 = tpu.matmul %5, %6, %cst {dimension_numbers = #tpu.dot_dimension_numbers<[1], [0], [0], [1], [0, 0, 1, 1], [], []>} : vector<16x16xbf16>, vector<16x16xbf16>, vector<16x16xf32> -> vector<16x16xf32>
    %c0_7 = arith.constant 0 : index
    %c0_8 = arith.constant 0 : index
    %c0_9 = arith.constant 0 : index
    %8 = vector.load %arg6[%c0_7, %c0_8, %c0_9] : memref<1x16x16xf32, #tpu.memory_space<vmem>>, vector<1x16x16xf32>
    %9 = vector.shape_cast %8 : vector<1x16x16xf32> to vector<16x16xf32>
    %10 = vector.shape_cast %7 : vector<16x16xf32> to vector<1x16x16xf32>
    tpu.vector_store %arg6[%c0_7, %c0_8, %c0_9], %10 {strides = array<i32>} : memref<1x16x16xf32, #tpu.memory_space<vmem>>, vector<1x16x16xf32>,
    %11 = arith.subf %4, %7 : vector<16x16xf32>
    %c0_10 = arith.constant 0 : index
    %c0_11 = arith.constant 0 : index
    %c0_12 = arith.constant 0 : index
    %12 = vector.load %arg5[%c0_10, %c0_11, %c0_12] : memref<1x16x16xf32, #tpu.memory_space<vmem>>, vector<1x16x16xf32>
    %13 = vector.shape_cast %12 : vector<1x16x16xf32> to vector<16x16xf32>
    %14 = vector.shape_cast %11 : vector<16x16xf32> to vector<1x16x16xf32>
    tpu.vector_store %arg5[%c0_10, %c0_11, %c0_12], %14 {strides = array<i32>} : memref<1x16x16xf32, #tpu.memory_space<vmem>>, vector<1x16x16xf32>,
    return
  }
  func.func @transform_0(%arg0: i32, %arg1: i32) -> (i32, i32) {
    %c0_i32 = arith.constant 0 : i32
    %c0_i32_0 = arith.constant 0 : i32
    %c0_i32_1 = arith.constant 0 : i32
    return %c0_i32, %c0_i32_0 : i32, i32
  }
  func.func @transform_1(%arg0: i32, %arg1: i32) -> (i32, i32, i32) {
    %c0_i32 = arith.constant 0 : i32
    %c0_i32_0 = arith.constant 0 : i32
    return %arg0, %c0_i32, %arg1 : i32, i32, i32
  }
  func.func @transform_2(%arg0: i32, %arg1: i32) -> (i32, i32, i32) {
    %c0_i32 = arith.constant 0 : i32
    %c0_i32_0 = arith.constant 0 : i32
    return %arg0, %c0_i32, %arg1 : i32, i32, i32
  }
  func.func @transform_3(%arg0: i32, %arg1: i32) -> (i32, i32, i32) {
    %c0_i32 = arith.constant 0 : i32
    %c0_i32_0 = arith.constant 0 : i32
    return %arg0, %c0_i32, %arg1 : i32, i32, i32
  }
  func.func @transform_4(%arg0: i32, %arg1: i32) -> (i32, i32, i32) {
    %c0_i32 = arith.constant 0 : i32
    %c0_i32_0 = arith.constant 0 : i32
    return %arg0, %c0_i32, %arg1 : i32, i32, i32
  }
}

module attributes {stable_mosaic.version = 11 : i64} {
  func.func @kernel(%arg0: i32, %arg1: memref<16x16xbf16, #tpu.memory_space<vmem>>, %arg2: memref<1x16x16xf32, #tpu.memory_space<vmem>>, %arg3: memref<16x32xbf16, #tpu.memory_space<vmem>>, %arg4: memref<32x16xbf16, #tpu.memory_space<vmem>>, %arg5: memref<1x16x16xf32, #tpu.memory_space<vmem>>, %arg6: memref<1x16x16xf32, #tpu.memory_space<vmem>>) attributes {dimension_semantics = [#tpu.dimension_semantics<parallel>], iteration_bounds = array<i64: 2>, scalar_prefetch = 0 : i64, scratch_operands = 0 : i64, tpu.core_type = #tpu.core_type<tc>, window_params = [{pipeline_mode = #tpu.pipeline_mode<synchronous>, transform_indices = @transform_0, window_bounds = array<i64: 16, 16>}, {transform_indices = @transform_1, window_bounds = array<i64: 1, 16, 16>}, {pipeline_mode = #tpu.pipeline_mode<synchronous>, transform_indices = @transform_2, window_bounds = array<i64: 16, 32>}, {pipeline_mode = #tpu.pipeline_mode<synchronous>, transform_indices = @transform_3, window_bounds = array<i64: 32, 16>}, {transform_indices = @transform_4, window_bounds = array<i64: 1, 16, 16>}, {transform_indices = @transform_5, window_bounds = array<i64: 1, 16, 16>}]} {
    %c0 = arith.constant 0 : index
    %c0_0 = arith.constant 0 : index
    %c0_1 = arith.constant 0 : index
    %0 = vector.load %arg2[%c0, %c0_0, %c0_1] : memref<1x16x16xf32, #tpu.memory_space<vmem>>, vector<1x16x16xf32>
    %1 = vector.shape_cast %0 : vector<1x16x16xf32> to vector<16x16xf32>
    %2 = arith.truncf %1 : vector<16x16xf32> to vector<16x16xbf16>
    %c0_2 = arith.constant 0 : index
    %c0_3 = arith.constant 0 : index
    %3 = vector.load %arg3[%c0_2, %c0_3] : memref<16x32xbf16, #tpu.memory_space<vmem>>, vector<16x32xbf16>
    %cst = arith.constant dense<0.000000e+00> : vector<16x32xf32>
    %4 = tpu.matmul %2, %3, %cst {dimension_numbers = #tpu.dot_dimension_numbers<[1], [0], [0], [1], [0, 0, 1, 1], [], []>} : vector<16x16xbf16>, vector<16x32xbf16>, vector<16x32xf32> -> vector<16x32xf32>
    %cst_4 = arith.constant 0.000000e+00 : f32
    %5 = vector.broadcast %cst_4 : f32 to vector<16x32xf32>
    %6 = arith.maximumf %4, %5 : vector<16x32xf32>
    %7 = arith.truncf %6 : vector<16x32xf32> to vector<16x32xbf16>
    %c0_5 = arith.constant 0 : index
    %c0_6 = arith.constant 0 : index
    %8 = vector.load %arg4[%c0_5, %c0_6] : memref<32x16xbf16, #tpu.memory_space<vmem>>, vector<32x16xbf16>
    %cst_7 = arith.constant dense<0.000000e+00> : vector<16x16xf32>
    %9 = tpu.matmul %7, %8, %cst_7 {dimension_numbers = #tpu.dot_dimension_numbers<[1], [0], [0], [1], [0, 0, 1, 1], [], []>} : vector<16x32xbf16>, vector<32x16xbf16>, vector<16x16xf32> -> vector<16x16xf32>
    %10 = arith.addf %1, %9 : vector<16x16xf32>
    %c0_8 = arith.constant 0 : index
    %c0_9 = arith.constant 0 : index
    %11 = vector.load %arg1[%c0_8, %c0_9] : memref<16x16xbf16, #tpu.memory_space<vmem>>, vector<16x16xbf16>
    %12 = arith.truncf %10 : vector<16x16xf32> to vector<16x16xbf16>
    %cst_10 = arith.constant dense<0.000000e+00> : vector<16x16xf32>
    %13 = tpu.matmul %11, %12, %cst_10 {dimension_numbers = #tpu.dot_dimension_numbers<[1], [0], [0], [1], [0, 0, 1, 1], [], []>} : vector<16x16xbf16>, vector<16x16xbf16>, vector<16x16xf32> -> vector<16x16xf32>
    %c0_11 = arith.constant 0 : index
    %c0_12 = arith.constant 0 : index
    %c0_13 = arith.constant 0 : index
    %14 = vector.load %arg6[%c0_11, %c0_12, %c0_13] : memref<1x16x16xf32, #tpu.memory_space<vmem>>, vector<1x16x16xf32>
    %15 = vector.shape_cast %14 : vector<1x16x16xf32> to vector<16x16xf32>
    %16 = vector.shape_cast %13 : vector<16x16xf32> to vector<1x16x16xf32>
    tpu.vector_store %arg6[%c0_11, %c0_12, %c0_13], %16 {strides = array<i32>} : memref<1x16x16xf32, #tpu.memory_space<vmem>>, vector<1x16x16xf32>,
    %17 = arith.subf %10, %13 : vector<16x16xf32>
    %c0_14 = arith.constant 0 : index
    %c0_15 = arith.constant 0 : index
    %c0_16 = arith.constant 0 : index
    %18 = vector.load %arg5[%c0_14, %c0_15, %c0_16] : memref<1x16x16xf32, #tpu.memory_space<vmem>>, vector<1x16x16xf32>
    %19 = vector.shape_cast %18 : vector<1x16x16xf32> to vector<16x16xf32>
    %20 = vector.shape_cast %17 : vector<16x16xf32> to vector<1x16x16xf32>
    tpu.vector_store %arg5[%c0_14, %c0_15, %c0_16], %20 {strides = array<i32>} : memref<1x16x16xf32, #tpu.memory_space<vmem>>, vector<1x16x16xf32>,
    return
  }
  func.func @transform_0(%arg0: i32) -> (i32, i32) {
    %c0_i32 = arith.constant 0 : i32
    %c0_i32_0 = arith.constant 0 : i32
    %c0_i32_1 = arith.constant 0 : i32
    return %c0_i32, %c0_i32_0 : i32, i32
  }
  func.func @transform_1(%arg0: i32) -> (i32, i32, i32) {
    %c0_i32 = arith.constant 0 : i32
    %c0_i32_0 = arith.constant 0 : i32
    %c0_i32_1 = arith.constant 0 : i32
    return %arg0, %c0_i32, %c0_i32_0 : i32, i32, i32
  }
  func.func @transform_2(%arg0: i32) -> (i32, i32) {
    %c0_i32 = arith.constant 0 : i32
    %c0_i32_0 = arith.constant 0 : i32
    %c0_i32_1 = arith.constant 0 : i32
    return %c0_i32, %c0_i32_0 : i32, i32
  }
  func.func @transform_3(%arg0: i32) -> (i32, i32) {
    %c0_i32 = arith.constant 0 : i32
    %c0_i32_0 = arith.constant 0 : i32
    %c0_i32_1 = arith.constant 0 : i32
    return %c0_i32, %c0_i32_0 : i32, i32
  }
  func.func @transform_4(%arg0: i32) -> (i32, i32, i32) {
    %c0_i32 = arith.constant 0 : i32
    %c0_i32_0 = arith.constant 0 : i32
    %c0_i32_1 = arith.constant 0 : i32
    return %arg0, %c0_i32, %c0_i32_0 : i32, i32, i32
  }
  func.func @transform_5(%arg0: i32) -> (i32, i32, i32) {
    %c0_i32 = arith.constant 0 : i32
    %c0_i32_0 = arith.constant 0 : i32
    %c0_i32_1 = arith.constant 0 : i32
    return %arg0, %c0_i32, %c0_i32_0 : i32, i32, i32
  }
}

module attributes {stable_mosaic.version = 11 : i64} {
  func.func @kernel(%arg0: i32, %arg1: memref<1x16x16xf32, #tpu.memory_space<vmem>>, %arg2: memref<48x4xbf16, #tpu.memory_space<vmem>>, %arg3: memref<1x16x4xf32, #tpu.memory_space<vmem>>) attributes {dimension_semantics = [#tpu.dimension_semantics<parallel>], iteration_bounds = array<i64: 2>, scalar_prefetch = 0 : i64, scratch_operands = 0 : i64, tpu.core_type = #tpu.core_type<tc>, window_params = [{transform_indices = @transform_0, window_bounds = array<i64: 1, 16, 16>}, {pipeline_mode = #tpu.pipeline_mode<synchronous>, transform_indices = @transform_1, window_bounds = array<i64: 48, 4>}, {transform_indices = @transform_2, window_bounds = array<i64: 1, 16, 4>}]} {
    %c0 = arith.constant 0 : index
    %c0_0 = arith.constant 0 : index
    %c0_1 = arith.constant 0 : index
    %0 = vector.load %arg1[%c0, %c0_0, %c0_1] : memref<1x16x16xf32, #tpu.memory_space<vmem>>, vector<1x16x16xf32>
    %1 = vector.shape_cast %0 : vector<1x16x16xf32> to vector<16x16xf32>
    %2 = vector.extract_strided_slice %1 {offsets = [15, 0], sizes = [1, 16], strides = [1, 1]} : vector<16x16xf32> to vector<1x16xf32>
    %3 = vector.extract_strided_slice %1 {offsets = [0, 0], sizes = [15, 16], strides = [1, 1]} : vector<16x16xf32> to vector<15x16xf32>
    %4 = tpu.concatenate %2, %3 in 0 : vector<1x16xf32>, vector<15x16xf32> -> vector<16x16xf32>
    %5 = vector.extract_strided_slice %1 {offsets = [1, 0], sizes = [15, 16], strides = [1, 1]} : vector<16x16xf32> to vector<15x16xf32>
    %6 = vector.extract_strided_slice %1 {offsets = [0, 0], sizes = [1, 16], strides = [1, 1]} : vector<16x16xf32> to vector<1x16xf32>
    %7 = tpu.concatenate %5, %6 in 0 : vector<15x16xf32>, vector<1x16xf32> -> vector<16x16xf32>
    %8 = tpu.concatenate %4, %1, %7 in 1 : vector<16x16xf32>, vector<16x16xf32>, vector<16x16xf32> -> vector<16x48xf32>
    %9 = arith.truncf %8 : vector<16x48xf32> to vector<16x48xbf16>
    %c0_2 = arith.constant 0 : index
    %c0_3 = arith.constant 0 : index
    %10 = vector.load %arg2[%c0_2, %c0_3] : memref<48x4xbf16, #tpu.memory_space<vmem>>, vector<48x4xbf16>
    %cst = arith.constant dense<0.000000e+00> : vector<16x4xf32>
    %11 = tpu.matmul %9, %10, %cst {dimension_numbers = #tpu.dot_dimension_numbers<[1], [0], [0], [1], [0, 0, 1, 1], [], []>} : vector<16x48xbf16>, vector<48x4xbf16>, vector<16x4xf32> -> vector<16x4xf32>
    %c0_4 = arith.constant 0 : index
    %c0_5 = arith.constant 0 : index
    %c0_6 = arith.constant 0 : index
    %12 = vector.load %arg3[%c0_4, %c0_5, %c0_6] : memref<1x16x4xf32, #tpu.memory_space<vmem>>, vector<1x16x4xf32>
    %13 = vector.shape_cast %12 : vector<1x16x4xf32> to vector<16x4xf32>
    %14 = vector.shape_cast %11 : vector<16x4xf32> to vector<1x16x4xf32>
    tpu.vector_store %arg3[%c0_4, %c0_5, %c0_6], %14 {strides = array<i32>} : memref<1x16x4xf32, #tpu.memory_space<vmem>>, vector<1x16x4xf32>,
    return
  }
  func.func @transform_0(%arg0: i32) -> (i32, i32, i32) {
    %c0_i32 = arith.constant 0 : i32
    %c0_i32_0 = arith.constant 0 : i32
    %c0_i32_1 = arith.constant 0 : i32
    return %arg0, %c0_i32, %c0_i32_0 : i32, i32, i32
  }
  func.func @transform_1(%arg0: i32) -> (i32, i32) {
    %c0_i32 = arith.constant 0 : i32
    %c0_i32_0 = arith.constant 0 : i32
    %c0_i32_1 = arith.constant 0 : i32
    return %c0_i32, %c0_i32_0 : i32, i32
  }
  func.func @transform_2(%arg0: i32) -> (i32, i32, i32) {
    %c0_i32 = arith.constant 0 : i32
    %c0_i32_0 = arith.constant 0 : i32
    %c0_i32_1 = arith.constant 0 : i32
    return %arg0, %c0_i32, %c0_i32_0 : i32, i32, i32
  }
}

module attributes {stable_mosaic.version = 11 : i64} {
  func.func @kernel(%arg0: i32, %arg1: i32, %arg2: i32, %arg3: memref<32x16xf32, #tpu.memory_space<vmem>>, %arg4: memref<16x4xbf16, #tpu.memory_space<vmem>>, %arg5: memref<1x4xf32, #tpu.memory_space<vmem>>, %arg6: memref<32x4xf32, #tpu.memory_space<vmem>>) attributes {dimension_semantics = [#tpu.dimension_semantics<parallel>, #tpu.dimension_semantics<parallel>, #tpu.dimension_semantics<arbitrary>], iteration_bounds = array<i64: 1, 1, 1>, scalar_prefetch = 0 : i64, scratch_operands = 0 : i64, tpu.core_type = #tpu.core_type<tc>, window_params = [{transform_indices = @transform_0, window_bounds = array<i64: 32, 16>}, {transform_indices = @transform_1, window_bounds = array<i64: 16, 4>}, {transform_indices = @transform_2, window_bounds = array<i64: 1, 4>}, {transform_indices = @transform_3, window_bounds = array<i64: 32, 4>}]} {
    %c0_i32 = arith.constant 0 : i32
    %0 = arith.cmpi eq, %arg2, %c0_i32 : i32
    %1 = arith.extui %0 : i1 to i32
    %c0_i32_0 = arith.constant 0 : i32
    %2 = arith.cmpi ne, %1, %c0_i32_0 : i32
    scf.if %2 {
      %cst_10 = arith.constant 0.000000e+00 : f32
      %13 = vector.broadcast %cst_10 : f32 to vector<32x4xf32>
      %c0_11 = arith.constant 0 : index
      %c0_12 = arith.constant 0 : index
      %14 = vector.load %arg6[%c0_11, %c0_12] : memref<32x4xf32, #tpu.memory_space<vmem>>, vector<32x4xf32>
      tpu.vector_store %arg6[%c0_11, %c0_12], %13 {strides = array<i32>} : memref<32x4xf32, #tpu.memory_space<vmem>>, vector<32x4xf32>,
    } else {
    }
    %c0 = arith.constant 0 : index
    %c0_1 = arith.constant 0 : index
    %3 = vector.load %arg6[%c0, %c0_1] : memref<32x4xf32, #tpu.memory_space<vmem>>, vector<32x4xf32>
    %c0_2 = arith.constant 0 : index
    %c0_3 = arith.constant 0 : index
    %4 = vector.load %arg3[%c0_2, %c0_3] : memref<32x16xf32, #tpu.memory_space<vmem>>, vector<32x16xf32>
    %5 = arith.truncf %4 : vector<32x16xf32> to vector<32x16xbf16>
    %c0_4 = arith.constant 0 : index
    %c0_5 = arith.constant 0 : index
    %6 = vector.load %arg4[%c0_4, %c0_5] : memref<16x4xbf16, #tpu.memory_space<vmem>>, vector<16x4xbf16>
    %cst = arith.constant dense<0.000000e+00> : vector<32x4xf32>
    %7 = tpu.matmul %5, %6, %cst {dimension_numbers = #tpu.dot_dimension_numbers<[1], [0], [0], [1], [0, 0, 1, 1], [], []>} : vector<32x16xbf16>, vector<16x4xbf16>, vector<32x4xf32> -> vector<32x4xf32>
    %8 = arith.addf %3, %7 : vector<32x4xf32>
    %c0_6 = arith.constant 0 : index
    %c0_7 = arith.constant 0 : index
    %9 = vector.load %arg6[%c0_6, %c0_7] : memref<32x4xf32, #tpu.memory_space<vmem>>, vector<32x4xf32>
    tpu.vector_store %arg6[%c0_6, %c0_7], %8 {strides = array<i32>} : memref<32x4xf32, #tpu.memory_space<vmem>>, vector<32x4xf32>,
    %c0_i32_8 = arith.constant 0 : i32
    %10 = arith.cmpi eq, %arg2, %c0_i32_8 : i32
    %11 = arith.extui %10 : i1 to i32
    %c0_i32_9 = arith.constant 0 : i32
    %12 = arith.cmpi ne, %11, %c0_i32_9 : i32
    scf.if %12 {
      %c0_10 = arith.constant 0 : index
      %c0_11 = arith.constant 0 : index
      %13 = vector.load %arg6[%c0_10, %c0_11] : memref<32x4xf32, #tpu.memory_space<vmem>>, vector<32x4xf32>
      %c0_12 = arith.constant 0 : index
      %c0_13 = arith.constant 0 : index
      %14 = vector.load %arg5[%c0_12, %c0_13] : memref<1x4xf32, #tpu.memory_space<vmem>>, vector<1x4xf32>
      %15 = vector.broadcast %14 : vector<1x4xf32> to vector<32x4xf32>
      %16 = arith.addf %13, %15 : vector<32x4xf32>
      %c0_14 = arith.constant 0 : index
      %c0_15 = arith.constant 0 : index
      %17 = vector.load %arg6[%c0_14, %c0_15] : memref<32x4xf32, #tpu.memory_space<vmem>>, vector<32x4xf32>
      tpu.vector_store %arg6[%c0_14, %c0_15], %16 {strides = array<i32>} : memref<32x4xf32, #tpu.memory_space<vmem>>, vector<32x4xf32>,
    } else {
    }
    return
  }
  func.func @transform_0(%arg0: i32, %arg1: i32, %arg2: i32) -> (i32, i32) {
    %c0_i32 = arith.constant 0 : i32
    return %arg0, %arg2 : i32, i32
  }
  func.func @transform_1(%arg0: i32, %arg1: i32, %arg2: i32) -> (i32, i32) {
    %c0_i32 = arith.constant 0 : i32
    return %arg2, %arg1 : i32, i32
  }
  func.func @transform_2(%arg0: i32, %arg1: i32, %arg2: i32) -> (i32, i32) {
    %c0_i32 = arith.constant 0 : i32
    %c0_i32_0 = arith.constant 0 : i32
    return %c0_i32, %arg1 : i32, i32
  }
  func.func @transform_3(%arg0: i32, %arg1: i32, %arg2: i32) -> (i32, i32) {
    %c0_i32 = arith.constant 0 : i32
    return %arg0, %arg1 : i32, i32
  }
}

</mosaic_0001>

<bundles_post_ra>
// kernel: _lambda_.24
= control target key start
LH: loop header
LB: loop body
LE: loop exit
PB: predicated region body
PF: predicated region fallthrough
CT: control target
= control target key end

     0   :  { %s405_s12 = smov 0   ;;  %s438_s0 = inlined_call_operand.vmem [shape: f32[2,16,4], index: 0, kind: input, shape index: {}]   ;;  %s439_s1 = inlined_call_operand.vmem [shape: bf16[12,16], index: 1, kind: input, shape index: {}]   ;;  %s440_s2 = inlined_call_operand.vmem [shape: f32[16,16], index: 2, kind: input, shape index: {}]   ;;  %s441_s3 = inlined_call_operand.vmem [shape: f32[2,16,16], index: 3, kind: output, shape index: {}]  }
   0x1 LB: > { %s327_s13 = sadd.s32 4294967295, %s379_s12   ;;  %p331_p0 = scmp.ge.s32.totalorder %s379_s12, 1  ;;  %s379_s12 = sphi %s405_s12, %s13_s12  }
   0x2   : > { %p137_p1 = scmp.lt.s32.totalorder %s379_s12, 3 }
   0x4   : > { %p138_p2 = pnand %p331_p0, %p137_p1 }
   0x5   : > { %p161_p3 = scmp.lt.s32.totalorder (!%p138_p2), %s327_s13, 1  ;;  %v381_v0 = vmov (!%p138_p2), 0.0   ;;  %v372_v1 = vld [vmem:[%s439_s1] sm:$0x3f] (!%p138_p2)   ;;  %vm224_vm0 = vcmask (!%p138_p2), 1045504   ;;  %vm382_vm1 = vmmov (!%p138_p2), 0  }
   0x6   : > { %141 = sbr.rel (%p138_p2) target bundleno = 360 (0x168), region = 32  ;;  %344 = vmatprep.subr.bf16.mxu0 (!%p138_p2), %v381_v0  ;;  %v226_v2 = vsel (!%p138_p2), %vm224_vm0, %v372_v1, 0  ;;  %346 = vmatprep.mubr.msk.bf16.mxu0 (!%p138_p2), %vm382_vm1, %v381_v0  ;;  %vm184_vm2 = vcmask (!%p138_p2), 1046528   ;;  %vm178_vm3 = vcmask (!%p138_p2), 1040384   ;;  %s383_s20 = smov (!%p138_p2), 4   ;;  %vm204_vm4 = vcmask (!%p138_p2), 31744  }
   0x7   : > { %345 = vmatpush3.bf16.msra.mxu0 (!%p138_p2), %v226_v2  ;;  %s384_s21 = smov (!%p138_p2), 8   ;;  %vm207_vm5 = vcmask (!%p138_p2), 64512   ;;  %vm220_vm6 = vcmask (!%p138_p2), 97280   ;;  %v213_v26 = vld [vmem:[%s440_s2] sm:$0xff] (!%p138_p2)  ;;  %vm269_vm7 = vcmask (!%p138_p2), 130048   ;;  %v214_v28 = vld [vmem:[%s440_s2 + $0x8] sm:$0xff] (!%p138_p2) }
   0xd   : > { %s443_s13 = smov (!%p161_p3, %s327_s13), 1 }
   0xe   : > { %s340_s16 = sshll.u32 %s443_s13, 4 }
   0xf   : > { %s165_s19 = scalar_lea.vmem %s438_s0, %s340_s16  ;;  %s170_s26 = scalar_lea.vmem %s441_s3, %s340_s16 }
  0x10   : > { %v172_v3 = vld [vmem:[%s165_s19] sm:$0xff]  ;;  %v173_v4 = vld [vmem:[%s165_s19 + $0x8] sm:$0xff] }
  0x11   : > { %v175_v5 = vrot.slane %v173_v4, 7  ;;  %v186_v6 = vrot.slane %v173_v4, 1  ;;  %v362_v7 = vpack.i.bf16 %v173_v4, %v172_v3  ;;  %v179_v8 = vrot.slane %v172_v3, 7 }
  0x12   : > { %v185_v9 = vrot.slane %v172_v3, 1 }
  0x13   : > { %363 = vrot.lane.b32.xlu0 %v362_v7, %s383_s20  ;;  %v180_v10 = vsel %vm178_vm3, %v179_v8, %v175_v5  ;;  %v183_v11 = vsel %vm178_vm3, %v175_v5, %v179_v8 }
  0x14   : > { %v187_v12 = vsel %vm184_vm2, %v185_v9, %v186_v6  ;;  %v190_v13 = vsel %vm184_vm2, %v186_v6, %v185_v9 }
  0x15   : > { %v367_v14 = vpack.i.bf16 %v190_v13, %v187_v12 }
  0x17   : > { %368 = vrot.lane.b32.xlu0 %v367_v14, %s384_s21 }
  0x85   : > { %v364_v15 = vpop.permute.xlu0 %363 }
  0x86   : > { %v366_v16 = vunpack.i.h.bf16 %v364_v15  ;;  %v365_v17 = vunpack.i.l.bf16 %v364_v15 }
  0x88   : > { %v205_v21 = vsel %vm204_vm4, %v183_v11, %v365_v17  ;;  %v206_v22 = vsel %vm204_vm4, %v180_v10, %v366_v16 }
  0x89   : > { %v369_v18 = vpop.permute.xlu0 %368 }
  0x8a   : > { %v371_v19 = vunpack.i.h.bf16 %v369_v18  ;;  %v370_v20 = vunpack.i.l.bf16 %v369_v18 }
  0x8c   : > { %v208_v23 = vsel %vm207_vm5, %v205_v21, %v370_v20  ;;  %v209_v24 = vsel %vm207_vm5, %v206_v22, %v371_v19 }
  0x8d   : > { %v210_v25 = vpack.c.bf16 %v209_v24, %v208_v23 }
  0x8f   : > { %347 = vmatmul.mubr.msk.bf16.vlgmr.msra.gmra.mrb[0].mxu0 %vm220_vm6, %v210_v25 }
 0x162   : > { %v262_v27 = vpop.f32.mrb[0].mxu0 }
 0x163   : > { %v263_v29 = vadd.f32 %v262_v27, %v213_v26  ;;  %v348_v30 = vpop.f32.mrb[1].mxu0 }
 0x164   : > { %v265_v31 = vpop.f32.mrb[2].mxu0 }
 0x165   : > { %270 = vst.msk [vmem:[%s170_s26] sm:$0xff] %vm269_vm7, %v263_v29  ;;  %v266_v32 = vadd.f32 %v265_v31, %v214_v28  ;;  %v349_v33 = vpop.f32.mrb[3].mxu0 }
 0x167   : > { %271 = vst.msk [vmem:[%s170_s26 + $0x8] sm:$0xff] %vm269_vm7, %v266_v32 }
 0x168 PF: > { %s13_s12 = sadd.s32 1, %s379_s12  }
 0x169   : > { %p10_p4 = scmp.ge.s32.totalorder %s13_s12, 4  }
 0x16b   :  { %12 = sbr.rel (!%p10_p4) target bundleno = 1 (0x1), region = 62 }

// kernel: _lambda_.19
= control target key start
LH: loop header
LB: loop body
LE: loop exit
PB: predicated region body
PF: predicated region fallthrough
CT: control target
= control target key end

     0   :  { %s515_s12 = smov 0   ;;  %s517_s13 = smov 0   ;;  %s554_s0 = inlined_call_operand.vmem [shape: bf16[16,16], index: 0, kind: input, shape index: {}]   ;;  %s555_s1 = inlined_call_operand.vmem [shape: f32[2,16,4], index: 1, kind: input, shape index: {}]   ;;  %s556_s2 = inlined_call_operand.vmem [shape: f32[2,16,4], index: 2, kind: output, shape index: {0}]   ;;  %s557_s3 = inlined_call_operand.vmem [shape: f32[2,16,4], index: 3, kind: output, shape index: {1}]  }
   0x1   :  { %s519_s14 = smov 0  }
   0x2 LB: > { %s26_s15 = sadd.s32 1, %s487_s13  ;;  %p420_p0 = scmp.ge.s32.totalorder %s491_s14, 1  ;;  %s491_s14 = sphi %s519_s14, %s14_s14   ;;  %s487_s13 = sphi %s517_s13, %s559_s13   ;;  %s483_s12 = sphi %s515_s12, %s558_s12  }
   0x3   : > { %p28_p1 = scmp.ge.s32.totalorder %s26_s15, 2  ;;  %p161_p2 = scmp.lt.s32.totalorder %s491_s14, 3 }
   0x5   : > { %s561_s15 = smov (%p28_p1, %s26_s15), 0  ;;  %p162_p3 = pnand %p420_p0, %p161_p2 }
   0x6   : > { %p199_p4 = scmp.lt.s32.totalorder (!%p162_p3), %s483_s12, 1  ;;  %v493_v0 = vmov (!%p162_p3), 0.0   ;;  %vm494_vm0 = vmmov (!%p162_p3), 0   ;;  %v468_v4 = vld [vmem:[%s554_s0] sm:$0xff] (!%p162_p3)   ;;  %vm234_vm1 = vcmask (!%p162_p3), 130048   ;;  %vm279_vm2 = vcmask (!%p162_p3), 31744  }
   0x7   : > { %165 = sbr.rel (%p162_p3) target bundleno = 240 (0xf0), region = 28  ;;  %436 = vmatprep.subr.bf16.mxu0 (!%p162_p3), %v493_v0  ;;  %438 = vmatprep.mubr.msk.bf16.mxu0 (!%p162_p3), %vm494_vm0, %v493_v0 }
   0xe   : > { %s563_s12 = smov (!%p199_p4, %s483_s12), 1 }
   0xf   : > { %s431_s16 = sshll.u32 %s563_s12, 4 }
  0x10   : > { %s206_s19 = scalar_lea.vmem %s555_s1, %s431_s16  ;;  %s222_s24 = scalar_lea.vmem %s557_s3, %s431_s16 }
  0x11   : > { %v224_v1 = vld [vmem:[%s206_s19] sm:$0xff]  ;;  %v225_v2 = vld [vmem:[%s206_s19 + $0x8] sm:$0xff]  ;;  %s214_s27 = scalar_lea.vmem %s556_s2, %s431_s16 }
  0x12   : > { %v228_v3 = vpack.c.bf16 %v225_v2, %v224_v1 }
  0x14   : > { %437 = vmatpush3.bf16.msra.mxu0 %v228_v3 }
  0x17   : > { %439 = vmatmul.mubr.msk.bf16.vlgmr.msra.gmra.mrb[0].mxu0 %vm234_vm1, %v468_v4 }
  0xea   : > { %v272_v5 = vpop.f32.mrb[0].mxu0 }
  0xeb   : > { %280 = vst.msk [vmem:[%s222_s24] sm:$0xff] %vm279_vm2, %v272_v5  ;;  %v282_v6 = vsub.f32 %v224_v1, %v272_v5  ;;  %v440_v7 = vpop.f32.mrb[1].mxu0 }
  0xec   : > { %v275_v8 = vpop.f32.mrb[2].mxu0 }
  0xed   : > { %284 = vst.msk [vmem:[%s214_s27] sm:$0xff] %vm279_vm2, %v282_v6  ;;  %281 = vst.msk [vmem:[%s222_s24 + $0x8] sm:$0xff] %vm279_vm2, %v275_v8  ;;  %v283_v9 = vsub.f32 %v225_v2, %v275_v8  ;;  %v441_v10 = vpop.f32.mrb[3].mxu0 }
  0xef   : > { %285 = vst.msk [vmem:[%s214_s27 + $0x8] sm:$0xff] %vm279_vm2, %v283_v9 }
  0xf0 PF: > { %s14_s14 = sadd.s32 1, %s491_s14   ;;  %s558_s12 = smov %s487_s13 }
  0xf1   : > { %p11_p5 = scmp.ge.s32.totalorder %s14_s14, 4   ;;  %s559_s13 = smov %s561_s15 }
  0xf3   :  { %13 = sbr.rel (!%p11_p5) target bundleno = 2 (0x2), region = 70 }

// kernel: _lambda_.25
= control target key start
LH: loop header
LB: loop body
LE: loop exit
PB: predicated region body
PF: predicated region fallthrough
CT: control target
= control target key end

     0   :  { %vm19_vm0 = vcmask 392192   ;;  %v148_v1 = vmov 0.0   ;;  %vm42_vm1 = vcmask 130048   ;;  %s259_s1 = inlined_call_operand.vmem [shape: bf16[16,48], index: 1, kind: input, shape index: {}]   ;;  %s260_s0 = inlined_call_operand.vmem [shape: f32[32,16], index: 0, kind: input, shape index: {}]   ;;  %s261_s3 = inlined_call_operand.vmem [shape: f32[32,48], index: 3, kind: output, shape index: {}]   ;;  %s262_s2 = inlined_call_operand.vmem [shape: f32[1,48], index: 2, kind: input, shape index: {}]  }
   0x1   :  { %v147_v0 = vld [vmem:[%s259_s1] sm:$0xff]   ;;  %22 = vst.msk [vmem:[%s261_s3 + $0x10] sm:$0xff] %vm19_vm0, %v148_v1  ;;  %20 = vst.msk [vmem:[%s261_s3] sm:$0xff] %vm19_vm0, %v148_v1  ;;  %v29_v3 = vld [vmem:[%s260_s0 + $0x8] sm:$0xff] }
   0x2   :  { %21 = vst.msk [vmem:[%s261_s3 + $0x8] sm:$0xff] %vm19_vm0, %v148_v1  ;;  %23 = vst.msk [vmem:[%s261_s3 + $0x18] sm:$0xff] %vm19_vm0, %v148_v1  ;;  %v28_v2 = vld [vmem:[%s260_s0] sm:$0xff]  ;;  %v30_v4 = vld [vmem:[%s260_s0 + $0x10] sm:$0xff]  ;;  %140 = vmatprep.subr.bf16.mxu0 %v147_v0 }
   0x3   :  { %v32_v5 = vpack.c.bf16 %v29_v3, %v28_v2  ;;  %v31_v6 = vld [vmem:[%s260_s0 + $0x18] sm:$0xff]  ;;  %141 = vmatpush3.bf16.msra.mxu0 %v147_v0  ;;  %v136_v20 = vld [vmem:[%s262_s2] ss:$0 sm:$0xff] }
   0x4   :  { %v33_v7 = vpack.c.bf16 %v31_v6, %v30_v4 }
   0x5   :  { %142 = vmatprep.mubr.msk.bf16.mxu0 %vm42_vm1, %v32_v5 }
   0x6   :  { %143 = vmatmul.mubr.msk.bf16.vlgmr.msra.gmra.mrb[0].mxu0 %vm42_vm1, %v33_v7 }
   0x8   :  { %v26_v8 = vld [vmem:[%s261_s3 + $0x10] sm:$0xff]  ;;  %v24_v9 = vld [vmem:[%s261_s3] sm:$0xff] }
   0x9   :  { %v27_v11 = vld [vmem:[%s261_s3 + $0x18] sm:$0xff]  ;;  %v25_v14 = vld [vmem:[%s261_s3 + $0x8] sm:$0xff] }
  0xd9   :  { %v144_v10 = vpop.f32.mrb[0].mxu0 }
  0xda   :  { %v100_v12 = vadd.f32 %v144_v10, %v26_v8  ;;  %v83_v13 = vpop.f32.mrb[1].mxu0 }
  0xdb   :  { %v98_v15 = vadd.f32 %v83_v13, %v24_v9  ;;  %v145_v16 = vpop.f32.mrb[2].mxu0 }
  0xdc   :  { %105 = vst.msk [vmem:[%s261_s3 + $0x10] sm:$0xff] %vm19_vm0, %v100_v12  ;;  %v101_v17 = vadd.f32 %v145_v16, %v27_v11  ;;  %v86_v18 = vpop.f32.mrb[3].mxu0 }
  0xdd   :  { %103 = vst.msk [vmem:[%s261_s3] sm:$0xff] %vm19_vm0, %v98_v15  ;;  %v99_v19 = vadd.f32 %v86_v18, %v25_v14 }
  0xde   :  { %106 = vst.msk [vmem:[%s261_s3 + $0x18] sm:$0xff] %vm19_vm0, %v101_v17 }
  0xdf   :  { %104 = vst.msk [vmem:[%s261_s3 + $0x8] sm:$0xff] %vm19_vm0, %v99_v19 }
  0xe3   :  { %v112_v21 = vld [vmem:[%s261_s3 + $0x10] sm:$0xff] }
  0xe4   :  { %v123_v22 = vadd.f32 %v136_v20, %v112_v21  ;;  %v110_v23 = vld [vmem:[%s261_s3] sm:$0xff] }
  0xe5   :  { %v121_v24 = vadd.f32 %v136_v20, %v110_v23  ;;  %v113_v25 = vld [vmem:[%s261_s3 + $0x18] sm:$0xff] }
  0xe6   :  { %127 = vst.msk [vmem:[%s261_s3 + $0x10] sm:$0xff] %vm19_vm0, %v123_v22  ;;  %v124_v26 = vadd.f32 %v136_v20, %v113_v25  ;;  %v111_v27 = vld [vmem:[%s261_s3 + $0x8] sm:$0xff] }
  0xe7   :  { %125 = vst.msk [vmem:[%s261_s3] sm:$0xff] %vm19_vm0, %v121_v24  ;;  %v122_v28 = vadd.f32 %v136_v20, %v111_v27 }
  0xe8   :  { %128 = vst.msk [vmem:[%s261_s3 + $0x18] sm:$0xff] %vm19_vm0, %v124_v26 }
  0xe9   :  { %126 = vst.msk [vmem:[%s261_s3 + $0x8] sm:$0xff] %vm19_vm0, %v122_v28 }

// kernel: _lambda_.27
= control target key start
LH: loop header
LB: loop body
LE: loop exit
PB: predicated region body
PF: predicated region fallthrough
CT: control target
= control target key end

     0   :  { %10 = vsyncpa [#allocation3], 0  ;;  %s831_s0 = inlined_call_operand.vmem [shape: bf16[16,16], index: 0, kind: input, shape index: {}]   ;;  %s832_s1 = inlined_call_operand.vmem [shape: f32[2,16,16], index: 1, kind: input, shape index: {}]   ;;  %s833_s2 = inlined_call_operand.vmem [shape: f32[2,16,16], index: 2, kind: input, shape index: {}]   ;;  %s834_s3 = inlined_call_operand.vmem [shape: f32[2,16,16], index: 3, kind: output, shape index: {0}]   ;;  %s835_s4 = inlined_call_operand.hbm [shape: f32[2,16,16], index: 4, kind: output, shape index: {1}]  }
   0x1   :  { %12 = vsyncpa [#allocation3 + $0x1], 0  ;;  %s698_s15 = smov 0   ;;  %s700_s16 = smov 0  }
   0x2   :  { %s702_s17 = smov 0   ;;  %s704_s18 = smov 0  }
   0x3   :  { %s706_s19 = smov 0   ;;  %s708_s20 = smov 0  }
   0x4 LB: > { %s497_s21 = sadd.s32 4294967295, %s666_s20   ;;  %s498_s22 = sadd.s32 4294967294, %s666_s20   ;;  %s666_s20 = sphi %s708_s20, %s18_s20   ;;  %s662_s19 = sphi %s706_s19, %s842_s19   ;;  %s658_s18 = sphi %s704_s18, %s841_s18   ;;  %s654_s17 = sphi %s702_s17, %s840_s17   ;;  %s650_s16 = sphi %s700_s16, %s839_s16   ;;  %s646_s15 = sphi %s698_s15, %s838_s15  }
   0x5   : > { %s30_s23 = sadd.s32 1, %s662_s19  ;;  %s144_s24 = sadd.s32 1, %s654_s17 }
   0x6   : > { %p32_p0 = scmp.ge.s32.totalorder %s30_s23, 2  ;;  %p154_p1 = scmp.ne.s32.totalorder %s654_s17, %s650_s16 }
   0x7   : > { %p155_p2 = scmp.eq.s32.totalorder %s497_s21, 1  ;;  %p160_p3 = scmp.ne.s32.totalorder %s650_s16, %s646_s15 }
   0x8   : > { %s844_s23 = smov (%p32_p0, %s30_s23), 0  ;;  %p161_p5 = scmp.eq.s32.totalorder %s498_s22, 1 }
   0x9   : > { %p738_p4 = por %p155_p2, %p154_p1  ;;  %s139_s26 = ssub.s32 %s662_s19, %s844_s23 }
   0xa   : > { %p501_p6 = scmp.ge.s32.totalorder %s666_s20, 1  ;;  %p142_p7 = scmp.eq.s32.totalorder %s139_s26, 0 }
   0xb   : > { %p745_p8 = por %p161_p5, %p160_p3  ;;  %p204_p9 = scmp.lt.s32.totalorder %s666_s20, 3 }
   0xc   : > { %s751_s28 = scalar_select %p142_p7, %s654_s17, %s144_s24  }
   0xd   : > { %p205_p10 = pnand %p501_p6, %p204_p9 }
   0xe   : > { %p249_p11 = scmp.lt.s32.totalorder (!%p205_p10), %s658_s18, 1  ;;  %v668_v0 = vmov (!%p205_p10), 0.0   ;;  %vm669_vm0 = vmmov (!%p205_p10), 0   ;;  %v587_v8 = vld [vmem:[%s831_s0] sm:$0xff] (!%p205_p10)   ;;  %vm288_vm1 = vcmask (!%p205_p10), 130048   ;;  %s246_s13 = sand.u32 (!%p205_p10), 1, %s650_s16  }
   0xf   : > { %208 = sbr.rel (%p205_p10) target bundleno = 264 (0x108), region = 32  ;;  %522 = vmatprep.subr.bf16.mxu0 (!%p205_p10), %v668_v0  ;;  %524 = vmatprep.mubr.msk.bf16.mxu0 (!%p205_p10), %vm669_vm0, %v668_v0  ;;  %s502_s14 = sshll.u32 (!%p205_p10), %s246_s13, 4 }
  0x10   : > { %s248_s21 = scalar_lea.vmem (!%p205_p10), [#allocation2], %s502_s14  ;;  %s519_s24 = sshll.u32 (!%p205_p10), %s658_s18, 8 }
  0x11   : > { %s365_s22 = sshll.u32 (!%p205_p10), %s248_s21, 4  ;;  %s777_s8 = scalar_lea.hbm (!%p205_p10), %s835_s4, %s519_s24  ;;  %s772_s22 = int_to_ptr.vmem [resolvable:$true] %s365_s22 }
  0x12   : > { %s670_s9 = smov (!%p205_p10), [#allocation2]  }
  0x16   : > { %s250_s29 = scalar_select %p249_p11, %s658_s18, 1 }
  0x17   : > { %s783_s18 = scalar_lea.sflag [#allocation3], %s246_s13 }
  0x18   : > { %s516_s30 = sshll.u32 %s250_s29, 4 }
  0x19   : > { %s256_s7 = scalar_lea.vmem %s832_s1, %s516_s30  ;;  %s264_s10 = scalar_lea.vmem %s833_s2, %s516_s30 }
  0x1a   : > { %v274_v1 = vld [vmem:[%s256_s7] sm:$0xff]  ;;  %v275_v2 = vld [vmem:[%s256_s7 + $0x8] sm:$0xff]  ;;  %s770_s5 = scalar_lea.vmem %s834_s3, %s516_s30  ;;  %s588_s30 = scalar_lea.vmem %s772_s22, 256 }
  0x1b   : > { %v276_v3 = vld [vmem:[%s264_s10] sm:$0xff]  ;;  %v277_v4 = vld [vmem:[%s264_s10 + $0x8] sm:$0xff]  ;;  %p589_p12 = scmp.ne.s32.totalorder %s772_s22, %s588_s30  ;;  %s592_s10 = sshll.u32 %s670_s9, 4  ;;  %s593_s10 = int_to_ptr.vmem [resolvable:$false] %s592_s10 }
  0x1c   : > { %v278_v5 = vadd.f32 %v276_v3, %v274_v1  ;;  %v279_v6 = vadd.f32 %v277_v4, %v275_v2  ;;  %s594_s11 = scalar_lea.vmem %s593_s10, 512  ;;  %p595_p1 = scmp.lt.s32.totalorder %s772_s22, %s593_s10 }
  0x1d   : > { %p590_p13 = pnand %p589_p12, %p738_p4  ;;  %p596_p2 = scmp.lt.s32.totalorder %s594_s11, %s588_s30 }
  0x1e   : > { %v282_v7 = vpack.c.bf16 %v279_v6, %v278_v5 }
  0x1f   : > { %p591_p0 = pneg %p590_p13  ;;  %p597_p3 = por %p596_p2, %p595_p1 }
  0x20   : > { %523 = vmatpush3.bf16.msra.mxu0 %v282_v7 }
  0x21   : > { %p598_p5 = pnand %p597_p3, %p591_p0 }
  0x23   : > { %525 = vmatmul.mubr.msk.bf16.vlgmr.msra.gmra.mrb[0].mxu0 %vm288_vm1, %v587_v8 }
  0xf6   : > { %v326_v9 = vpop.f32.mrb[0].mxu0 }
  0xf7   : > { %333 = vst.msk [vmem:[%s248_s21] sm:$0xff] %vm288_vm1, %v326_v9  ;;  %v335_v10 = vsub.f32 %v278_v5, %v326_v9  ;;  %v526_v11 = vpop.f32.mrb[1].mxu0 }
  0xf8   : > { %v329_v12 = vpop.f32.mrb[2].mxu0 }
  0xf9   : > { %337 = vst.msk [vmem:[%s770_s5] sm:$0xff] %vm288_vm1, %v335_v10  ;;  %334 = vst.msk [vmem:[%s248_s21 + $0x8] sm:$0xff] %vm288_vm1, %v329_v12  ;;  %v336_v13 = vsub.f32 %v279_v6, %v329_v12  ;;  %v527_v14 = vpop.f32.mrb[3].mxu0 }
  0xfa   : > { %601 = shalt.err (!%p598_p5)
}
  0xfb   : > { %s602_s12 = scalar_lea.hbm %s777_s8, 256  ;;  %s606_s21 = scalar_lea.hbm %s835_s4, 512 }
  0xfc   : > { %p603_p6 = scmp.ne.s32.totalorder %s777_s8, %s602_s12  ;;  %p607_p10 = scmp.lt.u32.totalorder %s777_s8, %s835_s4 }
  0xfd   : > { %p608_p11 = scmp.lt.u32.totalorder %s606_s21, %s602_s12  ;;  %p610_p13 = scmp.lt.u32.totalorder %s602_s12, %s777_s8 }
  0xfe   : > { %p604_p7 = pnand %p603_p6, %p738_p4 }
  0xff   : > { %p609_p12 = por %p608_p11, %p607_p10 }
 0x100   : > { %p605_p9 = pneg %p604_p7 }
 0x101   : > { %p611_p0 = por %p610_p13, %p609_p12 }
 0x103   : > { %p612_p1 = pnand %p611_p0, %p605_p9 }
 0x105   : > { %615 = shalt.err (!%p612_p1)
}
 0x106   : > { %s671_s29 = smov 128   ;;  %s672_s6 = smov 8   ;;  %338 = vst.msk [vmem:[%s770_s5 + $0x8] sm:$0xff] %vm288_vm1, %v336_v13 }
 0x107   : > { %528 = dma.vmem_to_hbm [thread:$0]  (%p738_p4), %s772_s22, 256, %s777_s8, %s783_s18, %s671_s29, %s671_s29, %s672_s6  }
 0x108 PF: > { %p534_p2 = scmp.ge.s32.totalorder %s666_s20, 2  ;;  %s391_s7 = sand.u32 1, %s646_s15  }
 0x109   : > { %s392_s30 = scalar_lea.sflag [#allocation3], %s391_s7 }
 0x10a   : > { %p531_p3 = pnand %p534_p2, %p745_p8 }
 0x10c   : > { %641 = dma.done.wait (!%p531_p3), %s392_s30, 256  }
 0x10d   : > { %643 = vsyncadd (!%p531_p3), %s392_s30, 4294967040  ;;  %s18_s20 = sadd.s32 1, %s666_s20   ;;  %s838_s15 = smov %s650_s16 }
 0x10e   : > { %p15_p5 = scmp.ge.s32.totalorder %s18_s20, 4   ;;  %s839_s16 = smov %s654_s17 }
 0x10f   : > { %s840_s17 = smov %s751_s28  ;;  %s841_s18 = smov %s662_s19 }
 0x110   : > { %s842_s19 = smov %s844_s23  ;;  %17 = sbr.rel (!%p15_p5) target bundleno = 4 (0x4), region = 82 }
 0x117   :  { %397 = vsyncpa [#allocation3], 1 }
 0x118   :  { %399 = vsyncpa [#allocation3 + $0x1], 1 }

// kernel: _lambda_.29
= control target key start
LH: loop header
LB: loop body
LE: loop exit
PB: predicated region body
PF: predicated region fallthrough
CT: control target
= control target key end

     0   :  { %s343_s12 = smov 0   ;;  %s381_s0 = inlined_call_operand.vmem [shape: f32[2,16,16], index: 0, kind: input, shape index: {}]   ;;  %s382_s1 = inlined_call_operand.vmem [shape: f32[1,16], index: 1, kind: input, shape index: {}]   ;;  %s383_s2 = inlined_call_operand.vmem [shape: f32[1,16], index: 2, kind: input, shape index: {}]   ;;  %s384_s3 = inlined_call_operand.vmem [shape: f32[2,16,16], index: 3, kind: output, shape index: {}]  }
   0x1 LB: > { %s288_s13 = sadd.s32 4294967295, %s321_s12   ;;  %p292_p0 = scmp.ge.s32.totalorder %s321_s12, 1  ;;  %s321_s12 = sphi %s343_s12, %s13_s12  }
   0x2   : > { %p137_p1 = scmp.lt.s32.totalorder %s321_s12, 3 }
   0x4   : > { %p138_p2 = pnand %p292_p0, %p137_p1 }
   0x5   : > { %p161_p3 = scmp.lt.s32.totalorder (!%p138_p2), %s288_s13, 1  ;;  %vm173_vm0 = vcmask (!%p138_p2), 130048   ;;  %v297_v21 = vld [vmem:[%s382_s1] ss:$0 sm:$0xff] (!%p138_p2) }
   0x6   : > { %141 = sbr.rel (%p138_p2) target bundleno = 354 (0x162), region = 32  ;;  %v298_v25 = vld [vmem:[%s383_s2] ss:$0 sm:$0xff] (!%p138_p2) }
   0xd   : > { %s386_s13 = smov (!%p161_p3, %s288_s13), 1 }
   0xe   : > { %s301_s14 = sshll.u32 %s386_s13, 4 }
   0xf   : > { %s165_s17 = scalar_lea.vmem %s381_s0, %s301_s14  ;;  %s170_s24 = scalar_lea.vmem %s384_s3, %s301_s14 }
  0x10   : > { %v171_v0 = vld [vmem:[%s165_s17] sm:$0xff]  ;;  %v172_v1 = vld [vmem:[%s165_s17 + $0x8] sm:$0xff] }
  0x11   : > { %v174_v2 = vsel %vm173_vm0, %v171_v0, 0.0  ;;  %v177_v3 = vsel %vm173_vm0, %v172_v1, 0.0 }
  0x12   : > { %175 = vadd.xlane.f32.xlu0 %v174_v2 }
  0x16   : > { %178 = vadd.xlane.f32.xlu0 %v177_v3 }
  0x9f   : > { %v176_v4 = vpop.xlane.xlu0 %175 }
  0xa0   : > { %v181_v5 = vmul.f32 0.0625, %v176_v4 }
  0xa2   : > { %v183_v6 = vsub.f32 %v171_v0, %v181_v5 }
  0xa3   : > { %v179_v7 = vpop.xlane.xlu0 %178 }
  0xa4   : > { %v182_v8 = vmul.f32 0.0625, %v179_v7  ;;  %v185_v9 = vmul.f32 %v183_v6, %v183_v6 }
  0xa6   : > { %v184_v10 = vsub.f32 %v172_v1, %v182_v8  ;;  %v187_v11 = vsel %vm173_vm0, %v185_v9, 0.0 }
  0xa7   : > { %188 = vadd.xlane.f32.xlu1 %v187_v11 }
  0xa8   : > { %v186_v12 = vmul.f32 %v184_v10, %v184_v10 }
  0xaa   : > { %v190_v13 = vsel %vm173_vm0, %v186_v12, 0.0 }
  0xab   : > { %191 = vadd.xlane.f32.xlu1 %v190_v13 }
 0x134   : > { %v189_v14 = vpop.xlane.xlu1 %188 }
 0x135   : > { %v193_v15 = vmul.f32 0.0625, %v189_v14 }
 0x137   : > { %v195_v16 = vadd.f32 1e-05, %v193_v15 }
 0x138   : > { %v192_v17 = vpop.xlane.xlu1 %191 }
 0x139   : > { %311 = vrsqrt.f32 %v195_v16  ;;  %v194_v18 = vmul.f32 0.0625, %v192_v17 }
 0x13b   : > { %v196_v19 = vadd.f32 1e-05, %v194_v18 }
 0x13d   : > { %313 = vrsqrt.f32 %v196_v19 }
 0x143   : > { %v312_v20 = vpop.eup %311 }
 0x144   : > { %v199_v22 = vmul.f32 %v312_v20, %v183_v6 }
 0x146   : > { %v208_v23 = vmul.f32 %v297_v21, %v199_v22 }
 0x147   : > { %v314_v24 = vpop.eup %313 }
 0x148   : > { %v200_v26 = vmul.f32 %v314_v24, %v184_v10  ;;  %v217_v27 = vadd.f32 %v298_v25, %v208_v23 }
 0x14a   : > { %v209_v28 = vmul.f32 %v297_v21, %v200_v26  ;;  %v219_v30 = vsel %vm173_vm0, %v217_v27, 0.0 }
 0x14c   : > { %v218_v29 = vadd.f32 %v298_v25, %v209_v28 }
 0x14e   : > { %v220_v31 = vsel %vm173_vm0, %v218_v29, 0.0 }
 0x14f   : > { %v221_v32 = vadd.f32 %v220_v31, %v219_v30 }
 0x151   : > { %v222_v33 = vrot.slane %v221_v32, 4 }
 0x153   : > { %v223_v34 = vadd.f32 %v222_v33, %v221_v32 }
 0x155   : > { %v224_v35 = vrot.slane %v223_v34, 2 }
 0x157   : > { %v225_v36 = vadd.f32 %v224_v35, %v223_v34 }
 0x159   : > { %v226_v37 = vrot.slane %v225_v36, 1 }
 0x15b   : > { %v227_v38 = vadd.f32 %v226_v37, %v225_v36 }
 0x15d   : > { %v228_v39 = vmul.f32 0.0625, %v227_v38 }
 0x15f   : > { %v229_v40 = vsub.f32 %v217_v27, %v228_v39  ;;  %v230_v41 = vsub.f32 %v218_v29, %v228_v39 }
 0x161   : > { %231 = vst.msk [vmem:[%s170_s24] sm:$0xff] %vm173_vm0, %v229_v40  ;;  %232 = vst.msk [vmem:[%s170_s24 + $0x8] sm:$0xff] %vm173_vm0, %v230_v41 }
 0x162 PF: > { %s13_s12 = sadd.s32 1, %s321_s12  }
 0x163   : > { %p10_p4 = scmp.ge.s32.totalorder %s13_s12, 4  }
 0x165   :  { %12 = sbr.rel (!%p10_p4) target bundleno = 1 (0x1), region = 62 }

// kernel: _lambda_.26
= control target key start
LH: loop header
LB: loop body
LE: loop exit
PB: predicated region body
PF: predicated region fallthrough
CT: control target
= control target key end

     0   :  { %vm19_vm0 = vcmask 130048   ;;  %v147_v1 = vmov 0.0   ;;  %s260_s1 = inlined_call_operand.vmem [shape: bf16[16,16], index: 1, kind: input, shape index: {}]   ;;  %s261_s0 = inlined_call_operand.vmem [shape: f32[32,16], index: 0, kind: input, shape index: {}]   ;;  %s262_s3 = inlined_call_operand.vmem [shape: f32[32,16], index: 3, kind: output, shape index: {}]   ;;  %s263_s2 = inlined_call_operand.vmem [shape: f32[1,16], index: 2, kind: input, shape index: {}]  }
   0x1   :  { %v146_v0 = vld [vmem:[%s260_s1] sm:$0xff]   ;;  %22 = vst.msk [vmem:[%s262_s3 + $0x10] sm:$0xff] %vm19_vm0, %v147_v1  ;;  %20 = vst.msk [vmem:[%s262_s3] sm:$0xff] %vm19_vm0, %v147_v1  ;;  %v29_v3 = vld [vmem:[%s261_s0 + $0x8] sm:$0xff] }
   0x2   :  { %21 = vst.msk [vmem:[%s262_s3 + $0x8] sm:$0xff] %vm19_vm0, %v147_v1  ;;  %23 = vst.msk [vmem:[%s262_s3 + $0x18] sm:$0xff] %vm19_vm0, %v147_v1  ;;  %v28_v2 = vld [vmem:[%s261_s0] sm:$0xff]  ;;  %v30_v4 = vld [vmem:[%s261_s0 + $0x10] sm:$0xff]  ;;  %139 = vmatprep.subr.bf16.mxu0 %v146_v0 }
   0x3   :  { %v32_v5 = vpack.c.bf16 %v29_v3, %v28_v2  ;;  %v31_v6 = vld [vmem:[%s261_s0 + $0x18] sm:$0xff]  ;;  %140 = vmatpush3.bf16.msra.mxu0 %v146_v0  ;;  %v135_v20 = vld [vmem:[%s263_s2] ss:$0 sm:$0xff] }
   0x4   :  { %v33_v7 = vpack.c.bf16 %v31_v6, %v30_v4 }
   0x5   :  { %141 = vmatprep.mubr.msk.bf16.mxu0 %vm19_vm0, %v32_v5 }
   0x6   :  { %142 = vmatmul.mubr.msk.bf16.vlgmr.msra.gmra.mrb[0].mxu0 %vm19_vm0, %v33_v7 }
   0x8   :  { %v26_v8 = vld [vmem:[%s262_s3 + $0x10] sm:$0xff]  ;;  %v24_v9 = vld [vmem:[%s262_s3] sm:$0xff] }
   0x9   :  { %v27_v11 = vld [vmem:[%s262_s3 + $0x18] sm:$0xff]  ;;  %v25_v14 = vld [vmem:[%s262_s3 + $0x8] sm:$0xff] }
  0xd9   :  { %v143_v10 = vpop.f32.mrb[0].mxu0 }
  0xda   :  { %v100_v12 = vadd.f32 %v143_v10, %v26_v8  ;;  %v83_v13 = vpop.f32.mrb[1].mxu0 }
  0xdb   :  { %v98_v15 = vadd.f32 %v83_v13, %v24_v9  ;;  %v144_v16 = vpop.f32.mrb[2].mxu0 }
  0xdc   :  { %104 = vst.msk [vmem:[%s262_s3 + $0x10] sm:$0xff] %vm19_vm0, %v100_v12  ;;  %v101_v17 = vadd.f32 %v144_v16, %v27_v11  ;;  %v86_v18 = vpop.f32.mrb[3].mxu0 }
  0xdd   :  { %102 = vst.msk [vmem:[%s262_s3] sm:$0xff] %vm19_vm0, %v98_v15  ;;  %v99_v19 = vadd.f32 %v86_v18, %v25_v14 }
  0xde   :  { %105 = vst.msk [vmem:[%s262_s3 + $0x18] sm:$0xff] %vm19_vm0, %v101_v17 }
  0xdf   :  { %103 = vst.msk [vmem:[%s262_s3 + $0x8] sm:$0xff] %vm19_vm0, %v99_v19 }
  0xe3   :  { %v111_v21 = vld [vmem:[%s262_s3 + $0x10] sm:$0xff] }
  0xe4   :  { %v122_v22 = vadd.f32 %v135_v20, %v111_v21  ;;  %v109_v23 = vld [vmem:[%s262_s3] sm:$0xff] }
  0xe5   :  { %v120_v24 = vadd.f32 %v135_v20, %v109_v23  ;;  %v112_v25 = vld [vmem:[%s262_s3 + $0x18] sm:$0xff] }
  0xe6   :  { %126 = vst.msk [vmem:[%s262_s3 + $0x10] sm:$0xff] %vm19_vm0, %v122_v22  ;;  %v123_v26 = vadd.f32 %v135_v20, %v112_v25  ;;  %v110_v27 = vld [vmem:[%s262_s3 + $0x8] sm:$0xff] }
  0xe7   :  { %124 = vst.msk [vmem:[%s262_s3] sm:$0xff] %vm19_vm0, %v120_v24  ;;  %v121_v28 = vadd.f32 %v135_v20, %v110_v27 }
  0xe8   :  { %127 = vst.msk [vmem:[%s262_s3 + $0x18] sm:$0xff] %vm19_vm0, %v123_v26 }
  0xe9   :  { %125 = vst.msk [vmem:[%s262_s3 + $0x8] sm:$0xff] %vm19_vm0, %v121_v28 }

// kernel: _lambda_.28
= control target key start
LH: loop header
LB: loop body
LE: loop exit
PB: predicated region body
PF: predicated region fallthrough
CT: control target
= control target key end

     0   :  { %11 = vsyncpa [#allocation3], 0  ;;  %s858_s0 = inlined_call_operand.vmem [shape: bf16[16,16], index: 0, kind: input, shape index: {}]   ;;  %s859_s1 = inlined_call_operand.vmem [shape: f32[2,16,16], index: 1, kind: input, shape index: {}]   ;;  %s860_s2 = inlined_call_operand.vmem [shape: bf16[16,32], index: 2, kind: input, shape index: {}]   ;;  %s861_s3 = inlined_call_operand.vmem [shape: bf16[32,16], index: 3, kind: input, shape index: {}]   ;;  %s862_s4 = inlined_call_operand.vmem [shape: f32[2,16,16], index: 4, kind: output, shape index: {0}]   ;;  %s863_s5 = inlined_call_operand.hbm [shape: f32[2,16,16], index: 5, kind: output, shape index: {1}]  }
   0x1   :  { %13 = vsyncpa [#allocation3 + $0x1], 0  ;;  %s723_s18 = smov 0   ;;  %s725_s19 = smov 0  }
   0x2   :  { %s727_s20 = smov 0   ;;  %s729_s21 = smov 0  }
   0x3 LB: > { %s744_s22 = sadd.s32 4294967295, %s686_s21   ;;  %s526_s23 = sadd.s32 4294967294, %s686_s21   ;;  %s686_s21 = sphi %s729_s21, %s869_s21   ;;  %s682_s20 = sphi %s727_s20, %s868_s20   ;;  %s678_s19 = sphi %s725_s19, %s867_s19   ;;  %s674_s18 = sphi %s723_s18, %s866_s18  }
   0x4   : > { %s748_s24 = sadd.s32 1, %s686_s21   ;;  %s141_s25 = sadd.s32 1, %s682_s20 }
   0x5   : > { %s138_s26 = ssub.s32 %s686_s21, %s748_s24  ;;  %p151_p0 = scmp.ne.s32.totalorder %s682_s20, %s678_s19 }
   0x6   : > { %p139_p1 = scmp.eq.s32.totalorder %s138_s26, 0  ;;  %p152_p2 = scmp.eq.s32.totalorder %s744_s22, 1 }
   0x7   : > { %p157_p3 = scmp.ne.s32.totalorder %s678_s19, %s674_s18  ;;  %p158_p4 = scmp.eq.s32.totalorder %s526_s23, 1 }
   0x8   : > { %s759_s27 = scalar_select %p139_p1, %s682_s20, %s141_s25  }
   0x9   : > { %p761_p5 = por %p152_p2, %p151_p0  ;;  %p765_p6 = por %p158_p4, %p157_p3 }
   0xa   : > { %p529_p7 = scmp.ge.s32.totalorder %s686_s21, 1  ;;  %p193_p8 = scmp.lt.s32.totalorder %s686_s21, 3 }
   0xc   : > { %p194_p9 = pnand %p529_p7, %p193_p8 }
   0xd   : > { %v620_v0 = vld [vmem:[%s860_s2] sm:$0xff] (!%p194_p9)   ;;  %v688_v1 = vmov (!%p194_p9), 0.0   ;;  %p226_p10 = scmp.lt.s32.totalorder (!%p194_p9), %s744_s22, 1  ;;  %vm689_vm0 = vmmov (!%p194_p9), 0   ;;  %vm248_vm1 = vcmask (!%p194_p9), 130048   ;;  %v622_v6 = vld [vmem:[%s861_s3 + $0x8] sm:$0xff] (!%p194_p9)  }
   0xe   : > { %197 = sbr.rel (%p194_p9) target bundleno = 696 (0x2b8), region = 36  ;;  %557 = vmatprep.subr.bf16.mxu0 (!%p194_p9), %v688_v1  ;;  %563 = vmatprep.subr.bf16.mxu1 (!%p194_p9), %v688_v1  ;;  %v621_v5 = vld [vmem:[%s861_s3] sm:$0xff] (!%p194_p9)   ;;  %vm312_vm2 = vcmask (!%p194_p9), 261120   ;;  %s223_s23 = sand.u32 (!%p194_p9), 1, %s678_s19  }
   0xf   : > { %558 = vmatpush3.bf16.msra.mxu0 (!%p194_p9), %v620_v0  ;;  %559 = vmatprep.mubr.msk.bf16.mxu0 (!%p194_p9), %vm689_vm0, %v688_v1  ;;  %v623_v21 = vld [vmem:[%s858_s0] sm:$0xff] (!%p194_p9)   ;;  %s530_s25 = sshll.u32 (!%p194_p9), %s223_s23, 4  ;;  %s549_s6 = sshll.u32 (!%p194_p9), %s744_s22, 8 }
  0x10   : > { %567 = vmatprep.mubr.msk.bf16.mxu1 (!%p194_p9), %vm689_vm0, %v688_v1  ;;  %571 = vmatprep.subr.bf16.mxu0 (!%p194_p9), %v688_v1  ;;  %s225_s26 = scalar_lea.vmem (!%p194_p9), [#allocation2], %s530_s25  ;;  %s809_s14 = scalar_lea.hbm (!%p194_p9), %s863_s5, %s549_s6 }
  0x11   : > { %564 = vmatpush3.bf16.msra.mxu1 (!%p194_p9), %v621_v5  ;;  %s439_s30 = sshll.u32 (!%p194_p9), %s225_s26, 4  ;;  %s804_s30 = int_to_ptr.vmem [resolvable:$true] %s439_s30 }
  0x12   : > { %565 = vmatprep.subr.bf16.mxu1 (!%p194_p9), %v688_v1 }
  0x15   : > { %s776_s7 = scalar_select %p226_p10, %s744_s22, 1  ;;  %566 = vmatpush3.bf16.msra.mxu1 %v622_v6 }
  0x16   : > { %s815_s22 = scalar_lea.sflag [#allocation3], %s223_s23 }
  0x17   : > { %s547_s8 = sshll.u32 %s776_s7, 4  ;;  %s624_s7 = scalar_lea.vmem %s804_s30, 256 }
  0x18   : > { %s230_s11 = scalar_lea.vmem %s859_s1, %s547_s8  ;;  %p625_p11 = scmp.ne.s32.totalorder %s804_s30, %s624_s7 }
  0x19   : > { %v237_v2 = vld [vmem:[%s230_s11] sm:$0xff]  ;;  %v238_v3 = vld [vmem:[%s230_s11 + $0x8] sm:$0xff]  ;;  %s802_s11 = scalar_lea.vmem %s862_s4, %s547_s8  ;;  %s690_s8 = smov [#allocation2]  }
  0x1a   : > { %v239_v4 = vpack.c.bf16 %v238_v3, %v237_v2  ;;  %p626_p12 = pnand %p625_p11, %p761_p5  ;;  %s628_s15 = sshll.u32 %s690_s8, 4  ;;  %s629_s15 = int_to_ptr.vmem [resolvable:$false] %s628_s15 }
  0x1b   : > { %s630_s16 = scalar_lea.vmem %s629_s15, 512  ;;  %p631_p0 = scmp.lt.s32.totalorder %s804_s30, %s629_s15 }
  0x1c   : > { %560 = vmatmul.mubr.msk.bf16.vlgmr.msra.gmra.mrb[0].mxu0 %vm248_vm1, %v239_v4  ;;  %p627_p13 = pneg %p626_p12  ;;  %p632_p1 = scmp.lt.s32.totalorder %s630_s16, %s624_s7 }
  0x1d   : > { %573 = vmatprep.mubr.msk.bf16.mxu0 %vm689_vm0, %v688_v1 }
  0x1e   : > { %p633_p2 = por %p632_p1, %p631_p0 }
  0x20   : > { %p634_p3 = pnand %p633_p2, %p627_p13 }
  0xef   : > { %v286_v7 = vpop.f32.mrb[0].mxu0 }
  0xf0   : > { %v561_v8 = vpop.f32.mrb[1].mxu0  ;;  %v293_v10 = vmax.f32 %v286_v7, 0.0 }
  0xf1   : > { %v289_v9 = vpop.f32.mrb[2].mxu0 }
  0xf2   : > { %v294_v11 = vmax.f32 %v289_v9, 0.0  ;;  %v562_v12 = vpop.f32.mrb[3].mxu0 }
  0xf4   : > { %v295_v13 = vpack.c.bf16 %v294_v11, %v293_v10 }
  0xf6   : > { %568 = vmatmul.mubr.msk.bf16.vlgmr.msra.gmra.mrb[0].mxu1 %vm312_vm2, %v295_v13 }
 0x1c9   : > { %v350_v14 = vpop.f32.mrb[0].mxu1 }
 0x1ca   : > { %v569_v15 = vpop.f32.mrb[1].mxu1  ;;  %v357_v17 = vadd.f32 %v350_v14, %v237_v2 }
 0x1cb   : > { %v353_v16 = vpop.f32.mrb[2].mxu1 }
 0x1cc   : > { %v358_v18 = vadd.f32 %v353_v16, %v238_v3  ;;  %v570_v19 = vpop.f32.mrb[3].mxu1 }
 0x1ce   : > { %v361_v20 = vpack.c.bf16 %v358_v18, %v357_v17 }
 0x1d0   : > { %572 = vmatpush3.bf16.msra.mxu0 %v361_v20 }
 0x1d3   : > { %574 = vmatmul.mubr.msk.bf16.vlgmr.msra.gmra.mrb[4].mxu0 %vm248_vm1, %v623_v21 }
 0x2a6   : > { %v404_v22 = vpop.f32.mrb[4].mxu0 }
 0x2a7   : > { %411 = vst.msk [vmem:[%s225_s26] sm:$0xff] %vm248_vm1, %v404_v22  ;;  %v413_v23 = vsub.f32 %v357_v17, %v404_v22  ;;  %v575_v24 = vpop.f32.mrb[5].mxu0 }
 0x2a8   : > { %v407_v25 = vpop.f32.mrb[6].mxu0 }
 0x2a9   : > { %415 = vst.msk [vmem:[%s802_s11] sm:$0xff] %vm248_vm1, %v413_v23  ;;  %412 = vst.msk [vmem:[%s225_s26 + $0x8] sm:$0xff] %vm248_vm1, %v407_v25  ;;  %v414_v26 = vsub.f32 %v358_v18, %v407_v25  ;;  %v576_v27 = vpop.f32.mrb[7].mxu0 }
 0x2aa   : > { %637 = shalt.err (!%p634_p3)
}
 0x2ab   : > { %s638_s17 = scalar_lea.hbm %s809_s14, 256  ;;  %s642_s26 = scalar_lea.hbm %s863_s5, 512 }
 0x2ac   : > { %p639_p4 = scmp.ne.s32.totalorder %s809_s14, %s638_s17  ;;  %p643_p9 = scmp.lt.u32.totalorder %s809_s14, %s863_s5 }
 0x2ad   : > { %p644_p10 = scmp.lt.u32.totalorder %s642_s26, %s638_s17  ;;  %p646_p12 = scmp.lt.u32.totalorder %s638_s17, %s809_s14 }
 0x2ae   : > { %p640_p7 = pnand %p639_p4, %p761_p5 }
 0x2af   : > { %p645_p11 = por %p644_p10, %p643_p9 }
 0x2b0   : > { %p641_p8 = pneg %p640_p7 }
 0x2b1   : > { %p647_p13 = por %p646_p12, %p645_p11 }
 0x2b3   : > { %p648_p0 = pnand %p647_p13, %p641_p8 }
 0x2b5   : > { %651 = shalt.err (!%p648_p0)
}
 0x2b6   : > { %s691_s10 = smov 128   ;;  %s692_s12 = smov 8   ;;  %416 = vst.msk [vmem:[%s802_s11 + $0x8] sm:$0xff] %vm248_vm1, %v414_v26 }
 0x2b7   : > { %577 = dma.vmem_to_hbm [thread:$0]  (%p761_p5), %s804_s30, 256, %s809_s14, %s815_s22, %s691_s10, %s691_s10, %s692_s12  }
 0x2b8 PF: > { %p583_p1 = scmp.ge.s32.totalorder %s686_s21, 2  ;;  %s462_s13 = sand.u32 1, %s674_s18  }
 0x2b9   : > { %s463_s7 = scalar_lea.sflag [#allocation3], %s462_s13 }
 0x2ba   : > { %p580_p2 = pnand %p583_p1, %p765_p6 }
 0x2bc   : > { %669 = dma.done.wait (!%p580_p2), %s463_s7, 256  }
 0x2bd   : > { %671 = vsyncadd (!%p580_p2), %s463_s7, 4294967040  ;;  %p16_p3 = scmp.ge.s32.totalorder %s748_s24, 4   ;;  %s866_s18 = smov %s678_s19 }
 0x2be   : > { %s867_s19 = smov %s682_s20  ;;  %s868_s20 = smov %s759_s27 }
 0x2bf   : > { %s869_s21 = smov %s748_s24  ;;  %18 = sbr.rel (!%p16_p3) target bundleno = 3 (0x3), region = 83 }
 0x2c6   :  { %468 = vsyncpa [#allocation3], 1 }
 0x2c7   :  { %470 = vsyncpa [#allocation3 + $0x1], 1 }

// kernel: _lambda_.30
= control target key start
LH: loop header
LB: loop body
LE: loop exit
PB: predicated region body
PF: predicated region fallthrough
CT: control target
= control target key end

     0   :  { %vm19_vm0 = vcmask 261120   ;;  %v148_v1 = vmov 0.0   ;;  %vm42_vm1 = vcmask 130048   ;;  %s259_s1 = inlined_call_operand.vmem [shape: bf16[16,32], index: 1, kind: input, shape index: {}]   ;;  %s260_s0 = inlined_call_operand.vmem [shape: f32[32,16], index: 0, kind: input, shape index: {}]   ;;  %s261_s3 = inlined_call_operand.vmem [shape: f32[32,32], index: 3, kind: output, shape index: {}]   ;;  %s262_s2 = inlined_call_operand.vmem [shape: f32[1,32], index: 2, kind: input, shape index: {}]  }
   0x1   :  { %v147_v0 = vld [vmem:[%s259_s1] sm:$0xff]   ;;  %22 = vst.msk [vmem:[%s261_s3 + $0x10] sm:$0xff] %vm19_vm0, %v148_v1  ;;  %20 = vst.msk [vmem:[%s261_s3] sm:$0xff] %vm19_vm0, %v148_v1  ;;  %v29_v3 = vld [vmem:[%s260_s0 + $0x8] sm:$0xff] }
   0x2   :  { %21 = vst.msk [vmem:[%s261_s3 + $0x8] sm:$0xff] %vm19_vm0, %v148_v1  ;;  %23 = vst.msk [vmem:[%s261_s3 + $0x18] sm:$0xff] %vm19_vm0, %v148_v1  ;;  %v28_v2 = vld [vmem:[%s260_s0] sm:$0xff]  ;;  %v30_v4 = vld [vmem:[%s260_s0 + $0x10] sm:$0xff]  ;;  %140 = vmatprep.subr.bf16.mxu0 %v147_v0 }
   0x3   :  { %v32_v5 = vpack.c.bf16 %v29_v3, %v28_v2  ;;  %v31_v6 = vld [vmem:[%s260_s0 + $0x18] sm:$0xff]  ;;  %141 = vmatpush3.bf16.msra.mxu0 %v147_v0  ;;  %v136_v20 = vld [vmem:[%s262_s2] ss:$0 sm:$0xff] }
   0x4   :  { %v33_v7 = vpack.c.bf16 %v31_v6, %v30_v4 }
   0x5   :  { %142 = vmatprep.mubr.msk.bf16.mxu0 %vm42_vm1, %v32_v5 }
   0x6   :  { %143 = vmatmul.mubr.msk.bf16.vlgmr.msra.gmra.mrb[0].mxu0 %vm42_vm1, %v33_v7 }
   0x8   :  { %v26_v8 = vld [vmem:[%s261_s3 + $0x10] sm:$0xff]  ;;  %v24_v9 = vld [vmem:[%s261_s3] sm:$0xff] }
   0x9   :  { %v27_v11 = vld [vmem:[%s261_s3 + $0x18] sm:$0xff]  ;;  %v25_v14 = vld [vmem:[%s261_s3 + $0x8] sm:$0xff] }
  0xd9   :  { %v144_v10 = vpop.f32.mrb[0].mxu0 }
  0xda   :  { %v100_v12 = vadd.f32 %v144_v10, %v26_v8  ;;  %v83_v13 = vpop.f32.mrb[1].mxu0 }
  0xdb   :  { %v98_v15 = vadd.f32 %v83_v13, %v24_v9  ;;  %v145_v16 = vpop.f32.mrb[2].mxu0 }
  0xdc   :  { %105 = vst.msk [vmem:[%s261_s3 + $0x10] sm:$0xff] %vm19_vm0, %v100_v12  ;;  %v101_v17 = vadd.f32 %v145_v16, %v27_v11  ;;  %v86_v18 = vpop.f32.mrb[3].mxu0 }
  0xdd   :  { %103 = vst.msk [vmem:[%s261_s3] sm:$0xff] %vm19_vm0, %v98_v15  ;;  %v99_v19 = vadd.f32 %v86_v18, %v25_v14 }
  0xde   :  { %106 = vst.msk [vmem:[%s261_s3 + $0x18] sm:$0xff] %vm19_vm0, %v101_v17 }
  0xdf   :  { %104 = vst.msk [vmem:[%s261_s3 + $0x8] sm:$0xff] %vm19_vm0, %v99_v19 }
  0xe3   :  { %v112_v21 = vld [vmem:[%s261_s3 + $0x10] sm:$0xff] }
  0xe4   :  { %v123_v22 = vadd.f32 %v136_v20, %v112_v21  ;;  %v110_v23 = vld [vmem:[%s261_s3] sm:$0xff] }
  0xe5   :  { %v121_v24 = vadd.f32 %v136_v20, %v110_v23  ;;  %v113_v25 = vld [vmem:[%s261_s3 + $0x18] sm:$0xff] }
  0xe6   :  { %127 = vst.msk [vmem:[%s261_s3 + $0x10] sm:$0xff] %vm19_vm0, %v123_v22  ;;  %v124_v26 = vadd.f32 %v136_v20, %v113_v25  ;;  %v111_v27 = vld [vmem:[%s261_s3 + $0x8] sm:$0xff] }
  0xe7   :  { %125 = vst.msk [vmem:[%s261_s3] sm:$0xff] %vm19_vm0, %v121_v24  ;;  %v122_v28 = vadd.f32 %v136_v20, %v111_v27 }
  0xe8   :  { %128 = vst.msk [vmem:[%s261_s3 + $0x18] sm:$0xff] %vm19_vm0, %v124_v26 }
  0xe9   :  { %126 = vst.msk [vmem:[%s261_s3 + $0x8] sm:$0xff] %vm19_vm0, %v122_v28 }

// kernel: _lambda_.23
= control target key start
LH: loop header
LB: loop body
LE: loop exit
PB: predicated region body
PF: predicated region fallthrough
CT: control target
= control target key end

     0   :  { %s602_s15 = smov 0   ;;  %s604_s16 = smov 0   ;;  %s644_s0 = inlined_call_operand.vmem [shape: bf16[16,16], index: 0, kind: input, shape index: {}]   ;;  %s645_s1 = inlined_call_operand.vmem [shape: f32[2,16,16], index: 1, kind: input, shape index: {}]   ;;  %s646_s2 = inlined_call_operand.vmem [shape: f32[2,16,16], index: 2, kind: input, shape index: {}]   ;;  %s647_s3 = inlined_call_operand.vmem [shape: f32[2,16,16], index: 3, kind: output, shape index: {0}]   ;;  %s648_s4 = inlined_call_operand.vmem [shape: f32[2,16,16], index: 4, kind: output, shape index: {1}]  }
   0x1   :  { %s606_s17 = smov 0  }
   0x2 LB: > { %s27_s18 = sadd.s32 1, %s569_s16  ;;  %p499_p0 = scmp.ge.s32.totalorder %s573_s17, 1  ;;  %s573_s17 = sphi %s606_s17, %s15_s17   ;;  %s569_s16 = sphi %s604_s16, %s650_s16   ;;  %s565_s15 = sphi %s602_s15, %s649_s15  }
   0x3   : > { %p29_p1 = scmp.ge.s32.totalorder %s27_s18, 2  ;;  %p201_p2 = scmp.lt.s32.totalorder %s573_s17, 3 }
   0x5   : > { %s652_s18 = smov (%p29_p1, %s27_s18), 0  ;;  %p202_p3 = pnand %p499_p0, %p201_p2 }
   0x6   : > { %p249_p4 = scmp.lt.s32.totalorder (!%p202_p3), %s565_s15, 1  ;;  %v575_v0 = vmov (!%p202_p3), 0.0   ;;  %vm576_vm0 = vmmov (!%p202_p3), 0   ;;  %v550_v8 = vld [vmem:[%s644_s0] sm:$0xff] (!%p202_p3)   ;;  %vm296_vm1 = vcmask (!%p202_p3), 130048  }
   0x7   : > { %205 = sbr.rel (%p202_p3) target bundleno = 243 (0xf3), region = 32  ;;  %518 = vmatprep.subr.bf16.mxu0 (!%p202_p3), %v575_v0  ;;  %520 = vmatprep.mubr.msk.bf16.mxu0 (!%p202_p3), %vm576_vm0, %v575_v0 }
   0xe   : > { %s654_s15 = smov (!%p249_p4, %s565_s15), 1 }
   0xf   : > { %s512_s19 = sshll.u32 %s654_s15, 4 }
  0x10   : > { %s256_s22 = scalar_lea.vmem %s645_s1, %s512_s19  ;;  %s264_s25 = scalar_lea.vmem %s646_s2, %s512_s19 }
  0x11   : > { %v282_v1 = vld [vmem:[%s256_s22] sm:$0xff]  ;;  %v283_v2 = vld [vmem:[%s256_s22 + $0x8] sm:$0xff]  ;;  %s280_s30 = scalar_lea.vmem %s648_s4, %s512_s19  ;;  %s272_s7 = scalar_lea.vmem %s647_s3, %s512_s19 }
  0x12   : > { %v284_v3 = vld [vmem:[%s264_s25] sm:$0xff]  ;;  %v285_v4 = vld [vmem:[%s264_s25 + $0x8] sm:$0xff] }
  0x13   : > { %v286_v5 = vadd.f32 %v284_v3, %v282_v1  ;;  %v287_v6 = vadd.f32 %v285_v4, %v283_v2 }
  0x15   : > { %v290_v7 = vpack.c.bf16 %v287_v6, %v286_v5 }
  0x17   : > { %519 = vmatpush3.bf16.msra.mxu0 %v290_v7 }
  0x1a   : > { %521 = vmatmul.mubr.msk.bf16.vlgmr.msra.gmra.mrb[0].mxu0 %vm296_vm1, %v550_v8 }
  0xed   : > { %v334_v9 = vpop.f32.mrb[0].mxu0 }
  0xee   : > { %341 = vst.msk [vmem:[%s280_s30] sm:$0xff] %vm296_vm1, %v334_v9  ;;  %v343_v10 = vsub.f32 %v286_v5, %v334_v9  ;;  %v522_v11 = vpop.f32.mrb[1].mxu0 }
  0xef   : > { %v337_v12 = vpop.f32.mrb[2].mxu0 }
  0xf0   : > { %345 = vst.msk [vmem:[%s272_s7] sm:$0xff] %vm296_vm1, %v343_v10  ;;  %342 = vst.msk [vmem:[%s280_s30 + $0x8] sm:$0xff] %vm296_vm1, %v337_v12  ;;  %v344_v13 = vsub.f32 %v287_v6, %v337_v12  ;;  %v523_v14 = vpop.f32.mrb[3].mxu0 }
  0xf2   : > { %346 = vst.msk [vmem:[%s272_s7 + $0x8] sm:$0xff] %vm296_vm1, %v344_v13 }
  0xf3 PF: > { %s15_s17 = sadd.s32 1, %s573_s17   ;;  %s649_s15 = smov %s569_s16 }
  0xf4   : > { %p12_p5 = scmp.ge.s32.totalorder %s15_s17, 4   ;;  %s650_s16 = smov %s652_s18 }
  0xf6   :  { %14 = sbr.rel (!%p12_p5) target bundleno = 2 (0x2), region = 77 }

// kernel: _lambda_.35
= control target key start
LH: loop header
LB: loop body
LE: loop exit
PB: predicated region body
PF: predicated region fallthrough
CT: control target
= control target key end

     0   :  { %s394_s9 = smov 0   ;;  %s427_s0 = inlined_call_operand.vmem [shape: f32[2,16,16], index: 0, kind: input, shape index: {}]   ;;  %s428_s1 = inlined_call_operand.vmem [shape: bf16[48,4], index: 1, kind: input, shape index: {}]   ;;  %s429_s2 = inlined_call_operand.vmem [shape: f32[2,16,4], index: 2, kind: output, shape index: {}]  }
   0x1 LB: > { %s311_s10 = sadd.s32 4294967295, %s373_s9   ;;  %p315_p0 = scmp.ge.s32.totalorder %s373_s9, 1  ;;  %s373_s9 = sphi %s394_s9, %s12_s9  }
   0x2   : > { %p112_p1 = scmp.lt.s32.totalorder %s373_s9, 3 }
   0x4   : > { %p113_p2 = pnand %p315_p0, %p112_p1 }
   0x5   : > { %p134_p3 = scmp.lt.s32.totalorder (!%p113_p2), %s311_s10, 1  ;;  %v375_v0 = vmov (!%p113_p2), 0.0   ;;  %v364_v1 = vld [vmem:[%s428_s1] sm:$0xff] (!%p113_p2)   ;;  %v365_v2 = vld [vmem:[%s428_s1 + $0x8] sm:$0xff] (!%p113_p2)   ;;  %vm376_vm0 = vmmov (!%p113_p2), 0   ;;  %vm157_vm1 = vcmask (!%p113_p2), 1046528  }
   0x6   : > { %116 = sbr.rel (%p113_p2) target bundleno = 358 (0x166), region = 28  ;;  %332 = vmatprep.subr.bf16.mxu0 (!%p113_p2), %v375_v0  ;;  %338 = vmatprep.mubr.msk.bf16.mxu0 (!%p113_p2), %vm376_vm0, %v375_v0  ;;  %vm151_vm2 = vcmask (!%p113_p2), 1040384   ;;  %v366_v9 = vld [vmem:[%s428_s1 + $0x10] sm:$0xff] (!%p113_p2)   ;;  %s377_s21 = smov (!%p113_p2), 16   ;;  %vm177_vm3 = vcmask (!%p113_p2), 130048   ;;  %vm180_vm4 = vcmask (!%p113_p2), 261120  }
   0x7   : > { %333 = vmatpush3.bf16.msra.mxu0 (!%p113_p2), %v364_v1  ;;  %s378_s22 = smov (!%p113_p2), 32   ;;  %vm208_vm5 = vcmask (!%p113_p2), 392192   ;;  %vm253_vm6 = vcmask (!%p113_p2), 31744  }
   0x8   : > { %334 = vmatprep.subr.bf16.mxu0 (!%p113_p2), %v375_v0 }
   0xb   : > { %335 = vmatpush3.bf16.msra.mxu0 (!%p113_p2), %v365_v2 }
   0xc   : > { %336 = vmatprep.subr.bf16.mxu0 (!%p113_p2), %v375_v0 }
   0xd   : > { %s431_s10 = smov (!%p134_p3, %s311_s10), 1 }
   0xe   : > { %s326_s15 = sshll.u32 %s431_s10, 4 }
   0xf   : > { %s138_s18 = scalar_lea.vmem %s427_s0, %s326_s15  ;;  %337 = vmatpush3.bf16.msra.mxu0 %v366_v9  ;;  %s143_s25 = scalar_lea.vmem %s429_s2, %s326_s15 }
  0x10   : > { %v145_v3 = vld [vmem:[%s138_s18] sm:$0xff]  ;;  %v146_v4 = vld [vmem:[%s138_s18 + $0x8] sm:$0xff] }
  0x11   : > { %v148_v5 = vrot.slane %v146_v4, 7  ;;  %v159_v6 = vrot.slane %v146_v4, 1  ;;  %v354_v7 = vpack.i.bf16 %v146_v4, %v145_v3  ;;  %v152_v8 = vrot.slane %v145_v3, 7 }
  0x12   : > { %v158_v10 = vrot.slane %v145_v3, 1 }
  0x13   : > { %355 = vrot.lane.b32.xlu0 %v354_v7, %s377_s21  ;;  %v153_v11 = vsel %vm151_vm2, %v152_v8, %v148_v5  ;;  %v156_v12 = vsel %vm151_vm2, %v148_v5, %v152_v8 }
  0x14   : > { %v160_v13 = vsel %vm157_vm1, %v158_v10, %v159_v6  ;;  %v163_v14 = vsel %vm157_vm1, %v159_v6, %v158_v10 }
  0x15   : > { %v359_v15 = vpack.i.bf16 %v163_v14, %v160_v13 }
  0x17   : > { %360 = vrot.lane.b32.xlu0 %v359_v15, %s378_s22 }
  0x85   : > { %v356_v16 = vpop.permute.xlu0 %355 }
  0x86   : > { %v358_v17 = vunpack.i.h.bf16 %v356_v16  ;;  %v357_v18 = vunpack.i.l.bf16 %v356_v16 }
  0x88   : > { %v178_v22 = vsel %vm177_vm3, %v156_v12, %v357_v18  ;;  %v179_v23 = vsel %vm177_vm3, %v153_v11, %v358_v17 }
  0x89   : > { %v361_v19 = vpop.permute.xlu0 %360 }
  0x8a   : > { %v363_v20 = vunpack.i.h.bf16 %v361_v19  ;;  %v362_v21 = vunpack.i.l.bf16 %v361_v19 }
  0x8c   : > { %v181_v24 = vsel %vm180_vm4, %v178_v22, %v362_v21  ;;  %v182_v25 = vsel %vm180_vm4, %v179_v23, %v363_v20 }
  0x8d   : > { %v183_v26 = vpack.c.bf16 %v182_v25, %v181_v24 }
  0x8f   : > { %339 = vmatmul.mubr.msk.bf16.vlgmr.msra.gmra.mrb[0].mxu0 %vm208_vm5, %v183_v26 }
 0x162   : > { %v246_v27 = vpop.f32.mrb[0].mxu0 }
 0x163   : > { %254 = vst.msk [vmem:[%s143_s25] sm:$0xff] %vm253_vm6, %v246_v27  ;;  %v340_v28 = vpop.f32.mrb[1].mxu0 }
 0x164   : > { %v249_v29 = vpop.f32.mrb[2].mxu0 }
 0x165   : > { %255 = vst.msk [vmem:[%s143_s25 + $0x8] sm:$0xff] %vm253_vm6, %v249_v29  ;;  %v341_v30 = vpop.f32.mrb[3].mxu0 }
 0x166 PF: > { %s12_s9 = sadd.s32 1, %s373_s9  }
 0x167   : > { %p9_p4 = scmp.ge.s32.totalorder %s12_s9, 4  }
 0x169   :  { %11 = sbr.rel (!%p9_p4) target bundleno = 1 (0x1), region = 58 }

// kernel: _lambda_.34
= control target key start
LH: loop header
LB: loop body
LE: loop exit
PB: predicated region body
PF: predicated region fallthrough
CT: control target
= control target key end

     0   :  { %s611_s18 = smov 0   ;;  %s654_s0 = inlined_call_operand.vmem [shape: bf16[16,16], index: 0, kind: input, shape index: {}]   ;;  %s655_s1 = inlined_call_operand.vmem [shape: f32[2,16,16], index: 1, kind: input, shape index: {}]   ;;  %s656_s2 = inlined_call_operand.vmem [shape: bf16[16,32], index: 2, kind: input, shape index: {}]   ;;  %s657_s3 = inlined_call_operand.vmem [shape: bf16[32,16], index: 3, kind: input, shape index: {}]   ;;  %s658_s4 = inlined_call_operand.vmem [shape: f32[2,16,16], index: 4, kind: output, shape index: {0}]   ;;  %s659_s5 = inlined_call_operand.vmem [shape: f32[2,16,16], index: 5, kind: output, shape index: {1}]  }
   0x1 LB: > { %s507_s19 = sadd.s32 4294967295, %s577_s18   ;;  %p511_p0 = scmp.ge.s32.totalorder %s577_s18, 1  ;;  %s577_s18 = sphi %s611_s18, %s16_s18  }
   0x2   : > { %p190_p1 = scmp.lt.s32.totalorder %s577_s18, 3 }
   0x4   : > { %p191_p2 = pnand %p511_p0, %p190_p1 }
   0x5   : > { %v567_v0 = vld [vmem:[%s656_s2] sm:$0xff] (!%p191_p2)   ;;  %v579_v1 = vmov (!%p191_p2), 0.0   ;;  %p223_p3 = scmp.lt.s32.totalorder (!%p191_p2), %s507_s19, 1  ;;  %vm580_vm0 = vmmov (!%p191_p2), 0   ;;  %vm250_vm1 = vcmask (!%p191_p2), 130048   ;;  %v569_v6 = vld [vmem:[%s657_s3 + $0x8] sm:$0xff] (!%p191_p2)  }
   0x6   : > { %194 = sbr.rel (%p191_p2) target bundleno = 675 (0x2a3), region = 36  ;;  %537 = vmatprep.subr.bf16.mxu0 (!%p191_p2), %v579_v1  ;;  %543 = vmatprep.subr.bf16.mxu1 (!%p191_p2), %v579_v1  ;;  %v568_v5 = vld [vmem:[%s657_s3] sm:$0xff] (!%p191_p2)   ;;  %vm314_vm2 = vcmask (!%p191_p2), 261120  }
   0x7   : > { %538 = vmatpush3.bf16.msra.mxu0 (!%p191_p2), %v567_v0  ;;  %539 = vmatprep.mubr.msk.bf16.mxu0 (!%p191_p2), %vm580_vm0, %v579_v1  ;;  %v570_v21 = vld [vmem:[%s654_s0] sm:$0xff] (!%p191_p2)  }
   0x8   : > { %547 = vmatprep.mubr.msk.bf16.mxu1 (!%p191_p2), %vm580_vm0, %v579_v1  ;;  %551 = vmatprep.subr.bf16.mxu0 (!%p191_p2), %v579_v1 }
   0x9   : > { %544 = vmatpush3.bf16.msra.mxu1 (!%p191_p2), %v568_v5 }
   0xa   : > { %545 = vmatprep.subr.bf16.mxu1 (!%p191_p2), %v579_v1 }
   0xd   : > { %s661_s19 = smov (!%p223_p3, %s507_s19), 1  ;;  %546 = vmatpush3.bf16.msra.mxu1 %v569_v6 }
   0xe   : > { %s622_s22 = sshll.u32 %s661_s19, 4 }
   0xf   : > { %s227_s25 = scalar_lea.vmem %s655_s1, %s622_s22  ;;  %s237_s9 = scalar_lea.vmem %s659_s5, %s622_s22 }
  0x10   : > { %v239_v2 = vld [vmem:[%s227_s25] sm:$0xff]  ;;  %v240_v3 = vld [vmem:[%s227_s25 + $0x8] sm:$0xff]  ;;  %s232_s12 = scalar_lea.vmem %s658_s4, %s622_s22 }
  0x11   : > { %v241_v4 = vpack.c.bf16 %v240_v3, %v239_v2 }
  0x13   : > { %540 = vmatmul.mubr.msk.bf16.vlgmr.msra.gmra.mrb[0].mxu0 %vm250_vm1, %v241_v4 }
  0x14   : > { %553 = vmatprep.mubr.msk.bf16.mxu0 %vm580_vm0, %v579_v1 }
  0xe6   : > { %v288_v7 = vpop.f32.mrb[0].mxu0 }
  0xe7   : > { %v541_v8 = vpop.f32.mrb[1].mxu0  ;;  %v295_v10 = vmax.f32 %v288_v7, 0.0 }
  0xe8   : > { %v291_v9 = vpop.f32.mrb[2].mxu0 }
  0xe9   : > { %v296_v11 = vmax.f32 %v291_v9, 0.0  ;;  %v542_v12 = vpop.f32.mrb[3].mxu0 }
  0xeb   : > { %v297_v13 = vpack.c.bf16 %v296_v11, %v295_v10 }
  0xed   : > { %548 = vmatmul.mubr.msk.bf16.vlgmr.msra.gmra.mrb[0].mxu1 %vm314_vm2, %v297_v13 }
 0x1c0   : > { %v352_v14 = vpop.f32.mrb[0].mxu1 }
 0x1c1   : > { %v549_v15 = vpop.f32.mrb[1].mxu1  ;;  %v359_v17 = vadd.f32 %v352_v14, %v239_v2 }
 0x1c2   : > { %v355_v16 = vpop.f32.mrb[2].mxu1 }
 0x1c3   : > { %v360_v18 = vadd.f32 %v355_v16, %v240_v3  ;;  %v550_v19 = vpop.f32.mrb[3].mxu1 }
 0x1c5   : > { %v363_v20 = vpack.c.bf16 %v360_v18, %v359_v17 }
 0x1c7   : > { %552 = vmatpush3.bf16.msra.mxu0 %v363_v20 }
 0x1ca   : > { %554 = vmatmul.mubr.msk.bf16.vlgmr.msra.gmra.mrb[4].mxu0 %vm250_vm1, %v570_v21 }
 0x29d   : > { %v406_v22 = vpop.f32.mrb[4].mxu0 }
 0x29e   : > { %413 = vst.msk [vmem:[%s237_s9] sm:$0xff] %vm250_vm1, %v406_v22  ;;  %v415_v23 = vsub.f32 %v359_v17, %v406_v22  ;;  %v555_v24 = vpop.f32.mrb[5].mxu0 }
 0x29f   : > { %v409_v25 = vpop.f32.mrb[6].mxu0 }
 0x2a0   : > { %417 = vst.msk [vmem:[%s232_s12] sm:$0xff] %vm250_vm1, %v415_v23  ;;  %414 = vst.msk [vmem:[%s237_s9 + $0x8] sm:$0xff] %vm250_vm1, %v409_v25  ;;  %v416_v26 = vsub.f32 %v360_v18, %v409_v25  ;;  %v556_v27 = vpop.f32.mrb[7].mxu0 }
 0x2a2   : > { %418 = vst.msk [vmem:[%s232_s12 + $0x8] sm:$0xff] %vm250_vm1, %v416_v26 }
 0x2a3 PF: > { %s16_s18 = sadd.s32 1, %s577_s18  }
 0x2a4   : > { %p13_p4 = scmp.ge.s32.totalorder %s16_s18, 4  }
 0x2a6   :  { %15 = sbr.rel (!%p13_p4) target bundleno = 1 (0x1), region = 78 }

// kernel: _lambda_.37
= control target key start
LH: loop header
LB: loop body
LE: loop exit
PB: predicated region body
PF: predicated region fallthrough
CT: control target
= control target key end

     0   :  { %vm19_vm0 = vcmask 31744   ;;  %v148_v1 = vmov 0.0   ;;  %vm42_vm1 = vcmask 130048   ;;  %s259_s1 = inlined_call_operand.vmem [shape: bf16[16,4], index: 1, kind: input, shape index: {}]   ;;  %s260_s0 = inlined_call_operand.vmem [shape: f32[32,16], index: 0, kind: input, shape index: {}]   ;;  %s261_s3 = inlined_call_operand.vmem [shape: f32[32,4], index: 3, kind: output, shape index: {}]   ;;  %s262_s2 = inlined_call_operand.vmem [shape: f32[1,4], index: 2, kind: input, shape index: {}]  }
   0x1   :  { %v147_v0 = vld [vmem:[%s259_s1] sm:$0xff]   ;;  %22 = vst.msk [vmem:[%s261_s3 + $0x10] sm:$0xff] %vm19_vm0, %v148_v1  ;;  %20 = vst.msk [vmem:[%s261_s3] sm:$0xff] %vm19_vm0, %v148_v1  ;;  %v29_v3 = vld [vmem:[%s260_s0 + $0x8] sm:$0xff] }
   0x2   :  { %21 = vst.msk [vmem:[%s261_s3 + $0x8] sm:$0xff] %vm19_vm0, %v148_v1  ;;  %23 = vst.msk [vmem:[%s261_s3 + $0x18] sm:$0xff] %vm19_vm0, %v148_v1  ;;  %v28_v2 = vld [vmem:[%s260_s0] sm:$0xff]  ;;  %v30_v4 = vld [vmem:[%s260_s0 + $0x10] sm:$0xff]  ;;  %140 = vmatprep.subr.bf16.mxu0 %v147_v0 }
   0x3   :  { %v32_v5 = vpack.c.bf16 %v29_v3, %v28_v2  ;;  %v31_v6 = vld [vmem:[%s260_s0 + $0x18] sm:$0xff]  ;;  %141 = vmatpush3.bf16.msra.mxu0 %v147_v0  ;;  %v136_v20 = vld [vmem:[%s262_s2] ss:$0 sm:$0xff] }
   0x4   :  { %v33_v7 = vpack.c.bf16 %v31_v6, %v30_v4 }
   0x5   :  { %142 = vmatprep.mubr.msk.bf16.mxu0 %vm42_vm1, %v32_v5 }
   0x6   :  { %143 = vmatmul.mubr.msk.bf16.vlgmr.msra.gmra.mrb[0].mxu0 %vm42_vm1, %v33_v7 }
   0x8   :  { %v26_v8 = vld [vmem:[%s261_s3 + $0x10] sm:$0xff]  ;;  %v24_v9 = vld [vmem:[%s261_s3] sm:$0xff] }
   0x9   :  { %v27_v11 = vld [vmem:[%s261_s3 + $0x18] sm:$0xff]  ;;  %v25_v14 = vld [vmem:[%s261_s3 + $0x8] sm:$0xff] }
  0xd9   :  { %v144_v10 = vpop.f32.mrb[0].mxu0 }
  0xda   :  { %v100_v12 = vadd.f32 %v144_v10, %v26_v8  ;;  %v83_v13 = vpop.f32.mrb[1].mxu0 }
  0xdb   :  { %v98_v15 = vadd.f32 %v83_v13, %v24_v9  ;;  %v145_v16 = vpop.f32.mrb[2].mxu0 }
  0xdc   :  { %105 = vst.msk [vmem:[%s261_s3 + $0x10] sm:$0xff] %vm19_vm0, %v100_v12  ;;  %v101_v17 = vadd.f32 %v145_v16, %v27_v11  ;;  %v86_v18 = vpop.f32.mrb[3].mxu0 }
  0xdd   :  { %103 = vst.msk [vmem:[%s261_s3] sm:$0xff] %vm19_vm0, %v98_v15  ;;  %v99_v19 = vadd.f32 %v86_v18, %v25_v14 }
  0xde   :  { %106 = vst.msk [vmem:[%s261_s3 + $0x18] sm:$0xff] %vm19_vm0, %v101_v17 }
  0xdf   :  { %104 = vst.msk [vmem:[%s261_s3 + $0x8] sm:$0xff] %vm19_vm0, %v99_v19 }
  0xe3   :  { %v112_v21 = vld [vmem:[%s261_s3 + $0x10] sm:$0xff] }
  0xe4   :  { %v123_v22 = vadd.f32 %v136_v20, %v112_v21  ;;  %v110_v23 = vld [vmem:[%s261_s3] sm:$0xff] }
  0xe5   :  { %v121_v24 = vadd.f32 %v136_v20, %v110_v23  ;;  %v113_v25 = vld [vmem:[%s261_s3 + $0x18] sm:$0xff] }
  0xe6   :  { %127 = vst.msk [vmem:[%s261_s3 + $0x10] sm:$0xff] %vm19_vm0, %v123_v22  ;;  %v124_v26 = vadd.f32 %v136_v20, %v113_v25  ;;  %v111_v27 = vld [vmem:[%s261_s3 + $0x8] sm:$0xff] }
  0xe7   :  { %125 = vst.msk [vmem:[%s261_s3] sm:$0xff] %vm19_vm0, %v121_v24  ;;  %v122_v28 = vadd.f32 %v136_v20, %v111_v27 }
  0xe8   :  { %128 = vst.msk [vmem:[%s261_s3 + $0x18] sm:$0xff] %vm19_vm0, %v124_v26 }
  0xe9   :  { %126 = vst.msk [vmem:[%s261_s3 + $0x8] sm:$0xff] %vm19_vm0, %v122_v28 }

</bundles_post_ra>
